<compile_context>
chip_gen: v7x
topology: tpu7x:2x2x1
jax: 0.10.0
libtpu: 0.0.40
codegen_flags: <defaults>
</compile_context>

<pallas_src>
import functools

import jax
import jax.numpy as jnp
import numpy as np
from jax.experimental import pallas as pl
from jax.experimental.pallas import tpu as pltpu


def _round_up(v, k):
    return ((v + k - 1) // k) * k


def phi_otflow_kernel(coef_ref, x_ref, w0_ref, b0_ref, wh_ref, bh_ref,
                      wcol_ref, out_ref, *, nTh, d):
    """One batch tile of Phi(s, x); batch sits on the lane axis.

    coef_ref : SMEM (d*d+d+1,)  [0.5*symA[:d,:d] row-major, lin coeffs, const]
    x_ref    : (d, B)           streamed input block (samples are columns)
    w0_ref   : (m, d)           W0[:, :d]            (opening, spatial part)
    b0_ref   : (m, 1)           b0 + s*W0[:, d]      (time column folded in)
    wh_ref   : (nTh-1, m, m)    hidden weights, natural "W @ u" orientation
    bh_ref   : (nTh-1, m, 1)    hidden biases (columns)
    wcol_ref : (m, 1)           w.weight as a column
    out_ref  : (1, B)           lane-dense output row
    """
    x = x_ref[...]                                     # (d, B)
    n_cols = x.shape[1]
    w0 = w0_ref[...]                                   # (m, d)
    m_rows = w0.shape[0]

    # --- ResNN opening: tanh(W0s x + b0).  K = d is tiny, so do d
    # broadcast-FMAs on the VPU instead of a ~1%-utilized MXU matmul.
    pre = jnp.broadcast_to(b0_ref[...], (m_rows, n_cols))
    for j in range(d):
        pre = pre + (jnp.broadcast_to(w0[:, j:j + 1], (m_rows, n_cols))
                     * jnp.broadcast_to(x[j:j + 1, :], (m_rows, n_cols)))
    u = jnp.tanh(pre)                                  # (m, B)

    # --- residual layers: u <- u + h * tanh(Wh[i] u + bh[i]) on the MXU,
    # full lane width (N = B).
    h = 1.0 / (nTh - 1)
    n_hidden = nTh - 1

    def layer(i, u):
        return u + h * jnp.tanh(
            jnp.dot(wh_ref[i], u, preferred_element_type=jnp.float32)
            + bh_ref[i])

    if n_hidden <= 4:
        for i in range(n_hidden):                      # small depth: unroll
            u = layer(i, u)
    else:                                              # deep: bounded live ranges
        u = jax.lax.fori_loop(0, n_hidden, layer, u, unroll=True)

    # --- w' * N(y): broadcast multiply + sublane reduce (no N=1 matmul).
    w_term = jnp.sum(u * wcol_ref[...], axis=0, keepdims=True)      # (1, B)

    # --- 0.5*y'(A'A)y + c(y) with y=[x;s]: time column folded into coef;
    # fully unrolled on the VPU from SMEM scalars (d is small for OT-flow).
    qlin = jnp.zeros((1, n_cols), jnp.float32) + coef_ref[d * d + d]
    for i in range(d):
        acc = coef_ref[d * d + i]                      # lin_i (scalar)
        for j in range(d):
            acc = acc + coef_ref[i * d + j] * x[j:j + 1, :]
        qlin = qlin + x[i:i + 1, :] * acc

    out_ref[...] = w_term + qlin


def phi_otflow_forward(s, x, params, nTh, block_cols=8192):
    """XLA glue: fold the time column, flip batch onto lanes, tile the batch."""
    nex, d = x.shape
    m = params["W0"].shape[0]
    assert nTh >= 2, "Phi_OTflow / ResNN require nTh >= 2"
    # TODO(synk): for d > 16 the quadratic form should go back on the MXU
    # (jnp.dot) instead of the unrolled VPU/SMEM path used here.
    assert d <= 16, "unrolled quadratic path assumes a small spatial dimension"
    s = jnp.asarray(s, jnp.float32)

    # ---- fold constants once in XLA (outside the kernel) --------------------
    symA = params["A"].T @ params["A"]                       # (d+1, d+1)
    W0 = params["W0"]                                        # (m, d+1)
    w0s = W0[:, :d]                                          # (m, d)
    b0col = (params["b0"] + s * W0[:, d][None, :]).reshape(m, 1)       # (m, 1)
    wh = params["Wh"]                                        # (nTh-1, m, m)
    bhcol = jnp.transpose(params["bh"], (0, 2, 1))           # (nTh-1, m, 1)
    wcol = params["w_w"].reshape(m, 1)                       # (m, 1)
    lin = s * symA[:d, d] + params["c_w"][0, :d]             # (d,)
    const = (0.5 * s * s * symA[d, d] + s * params["c_w"][0, d]
             + params["c_b"][0, 0])
    coef = jnp.concatenate([(0.5 * symA[:d, :d]).reshape(-1),
                            lin, const.reshape(1)]).astype(jnp.float32)

    # ---- pick the batch tile B from a generation-aware VMEM budget ----------
    lane, f32 = 128, 4
    subl_m, subl_d = _round_up(m, 8), _round_up(d, 8)
    lanes_m, lanes_d = _round_up(m, lane), _round_up(d, lane)
    try:
        vmem_cap = int(pltpu.get_tpu_info().vmem_capacity_bytes)
    except Exception:                                        # pragma: no cover
        vmem_cap = 32 << 20                                  # conservative
    budget = int(0.70 * vmem_cap)

    # resident weights (constant index_map, double-buffered by default)
    weight_bytes = 2 * f32 * (subl_m * lanes_d
                              + 2 * subl_m * lane
                              + (nTh - 1) * (subl_m * lanes_m + subl_m * lane))
    # per-column bytes: double-buffered x / out tiles + (m, B) temporaries
    per_col_bytes = f32 * (2 * subl_d + 2 * 8 + 4 * subl_m)

    b_budget = (budget - weight_bytes - (4 << 20)) // per_col_bytes
    B = int(min(block_cols, max(lane, b_budget), _round_up(nex, lane)))
    B = max(lane, (B // lane) * lane)

    # keep >= 2 (and an even number of) grid steps when there is enough work,
    # so the "parallel" batch axis shards across both TensorCores on v7x.
    if nex >= 2 * lane:
        B = min(B, _round_up(-(-nex // 2), lane))
    nb = -(-nex // B)
    if nb > 1 and nb % 2 == 1:
        nb += 1
    B = max(lane, _round_up(-(-nex // nb), lane))
    num_blocks = nb
    padded = num_blocks * B

    need = weight_bytes + per_col_bytes * B
    vmem_limit = int(min(max(int(1.5 * need) + (2 << 20), 16 << 20),
                         int(0.85 * vmem_cap)))

    # ---- batch on lanes: stream x as (d, padded) columns ---------------------
    xt = jnp.transpose(x).astype(jnp.float32)                # (d, nex)
    if padded != nex:
        xt = jnp.pad(xt, ((0, 0), (0, padded - nex)))

    kernel = functools.partial(phi_otflow_kernel, nTh=nTh, d=d)
    grid_spec = pltpu.PrefetchScalarGridSpec(
        num_scalar_prefetch=1,                               # coef -> SMEM
        grid=(num_blocks,),
        in_specs=[
            pl.BlockSpec((d, B), lambda i, c: (0, i)),               # x columns
            pl.BlockSpec((m, d), lambda i, c: (0, 0)),               # W0 spatial
            pl.BlockSpec((m, 1), lambda i, c: (0, 0)),               # b0 (eff)
            pl.BlockSpec((nTh - 1, m, m), lambda i, c: (0, 0, 0)),   # hidden W
            pl.BlockSpec((nTh - 1, m, 1), lambda i, c: (0, 0, 0)),   # hidden b
            pl.BlockSpec((m, 1), lambda i, c: (0, 0)),               # w column
        ],
        out_specs=pl.BlockSpec((1, B), lambda i, c: (0, i)),         # lane-dense
    )

    out = pl.pallas_call(
        kernel,
        out_shape=jax.ShapeDtypeStruct((1, padded), jnp.float32),
        grid_spec=grid_spec,
        compiler_params=pltpu.CompilerParams(
            dimension_semantics=("parallel",),
            vmem_limit_bytes=vmem_limit),
    )(coef, xt, w0s, b0col, wh, bhcol, wcol)

    return out[0, :nex].reshape(nex, 1)


def phi_otflow_reference(s, x, params, nTh):
    """Pure-JAX reference mirroring the PyTorch module, for validation."""
    nex, d = x.shape
    y = jnp.concatenate([x, jnp.full((nex, 1), s, dtype=x.dtype)], axis=1)
    u = jnp.tanh(y @ params["W0"].T + params["b0"])
    h = 1.0 / (nTh - 1)
    for i in range(nTh - 1):
        u = u + h * jnp.tanh(u @ params["Wh"][i].T + params["bh"][i])
    symA = params["A"].T @ params["A"]
    w_term = u @ params["w_w"].T
    quad = 0.5 * jnp.sum((y @ symA) * y, axis=1, keepdims=True)
    c_term = y @ params["c_w"].T + params["c_b"]
    return w_term + quad + c_term


def init_params(key, d, m, nTh, r=10):
    """Deterministic synthetic init matching the module's parameter shapes."""
    d1 = d + 1
    r = min(r, d1)
    k = jax.random.split(key, 5)

    # A: xavier uniform, shape (r, d+1)
    bound_a = float(np.sqrt(6.0 / (r + d1)))
    A = jax.random.uniform(k[0], (r, d1), jnp.float32, -bound_a, bound_a)

    # opening layer: Linear(d+1, m)
    b0w = 1.0 / float(np.sqrt(d1))
    W0 = jax.random.uniform(k[1], (m, d1), jnp.float32, -b0w, b0w)
    b0 = jax.random.uniform(k[2], (1, m), jnp.float32, -b0w, b0w)

    # hidden layers: Linear(m, m), stacked (nTh-1, m, m)
    bhw = 1.0 / float(np.sqrt(m))
    Wh = jax.random.uniform(k[3], (nTh - 1, m, m), jnp.float32, -bhw, bhw)
    bh = jax.random.uniform(k[4], (nTh - 1, 1, m), jnp.float32, -bhw, bhw)

    # w.weight = ones, c.weight = zeros, c.bias = zeros (as in __init__)
    w_w = jnp.ones((1, m), jnp.float32)
    c_w = jnp.zeros((1, d1), jnp.float32)
    c_b = jnp.zeros((1, 1), jnp.float32)

    return {"A": A, "W0": W0, "b0": b0, "Wh": Wh, "bh": bh,
            "w_w": w_w, "c_w": c_w, "c_b": c_b}


if __name__ == "__main__":
    # run all matmuls (kernel and reference) at highest precision so the f32
    # comparison tolerance below is meaningful.
    jax.config.update("jax_default_matmul_precision", "highest")

    nex, d, m, nTh = 1000, 3, 32, 3
    s = 0.5

    key = jax.random.PRNGKey(0)
    kx, kp = jax.random.split(key)
    x = jax.random.normal(kx, (nex, d), jnp.float32)
    params = init_params(kp, d, m, nTh)

    # small block_cols so the test exercises a multi-step (even-length) grid:
    # 1000 rows -> B=256 columns/tile -> 4 grid steps.
    out = phi_otflow_forward(s, x, params, nTh, block_cols=256)
    out = jax.block_until_ready(out)

    ref = phi_otflow_reference(s, x, params, nTh)
    np.testing.assert_allclose(np.asarray(out), np.asarray(ref),
                               rtol=1e-5, atol=2e-5)
    assert out.shape == (nex, 1)
    print("KERNEL_OK")
</pallas_src>

<mosaic_0001>
module attributes {stable_mosaic.version = 11 : i64} {
  func.func @phi_otflow_kernel(%arg0: i32, %arg1: memref<13xf32, #tpu.memory_space<smem>>, %arg2: memref<3x256xf32, #tpu.memory_space<vmem>>, %arg3: memref<32x3xf32, #tpu.memory_space<vmem>>, %arg4: memref<32x1xf32, #tpu.memory_space<vmem>>, %arg5: memref<2x32x32xf32, #tpu.memory_space<vmem>>, %arg6: memref<2x32x1xf32, #tpu.memory_space<vmem>>, %arg7: memref<32x1xf32, #tpu.memory_space<vmem>>, %arg8: memref<1x256xf32, #tpu.memory_space<vmem>>) attributes {dimension_semantics = [#tpu.dimension_semantics<parallel>], iteration_bounds = array<i64: 4>, scalar_prefetch = 1 : i64, scratch_operands = 0 : i64, tpu.core_type = #tpu.core_type<tc>, window_params = [{transform_indices = @transform_0, window_bounds = array<i64: 3, 256>}, {pipeline_mode = #tpu.pipeline_mode<synchronous>, transform_indices = @transform_1, window_bounds = array<i64: 32, 3>}, {pipeline_mode = #tpu.pipeline_mode<synchronous>, transform_indices = @transform_2, window_bounds = array<i64: 32, 1>}, {pipeline_mode = #tpu.pipeline_mode<synchronous>, transform_indices = @transform_3, window_bounds = array<i64: 2, 32, 32>}, {pipeline_mode = #tpu.pipeline_mode<synchronous>, transform_indices = @transform_4, window_bounds = array<i64: 2, 32, 1>}, {pipeline_mode = #tpu.pipeline_mode<synchronous>, transform_indices = @transform_5, window_bounds = array<i64: 32, 1>}, {transform_indices = @transform_6, window_bounds = array<i64: 1, 256>}]} {
    %c0 = arith.constant 0 : index
    %c0_0 = arith.constant 0 : index
    %0 = vector.load %arg2[%c0, %c0_0] : memref<3x256xf32, #tpu.memory_space<vmem>>, vector<3x256xf32>
    %c0_1 = arith.constant 0 : index
    %c0_2 = arith.constant 0 : index
    %1 = vector.load %arg3[%c0_1, %c0_2] : memref<32x3xf32, #tpu.memory_space<vmem>>, vector<32x3xf32>
    %c0_3 = arith.constant 0 : index
    %c0_4 = arith.constant 0 : index
    %2 = vector.load %arg4[%c0_3, %c0_4] : memref<32x1xf32, #tpu.memory_space<vmem>>, vector<32x1xf32>
    %3 = vector.shape_cast %2 : vector<32x1xf32> to vector<32x1xf32>
    %4 = vector.broadcast %3 : vector<32x1xf32> to vector<32x256xf32>
    %5 = vector.extract_strided_slice %1 {offsets = [0, 0], sizes = [32, 1], strides = [1, 1]} : vector<32x3xf32> to vector<32x1xf32>
    %6 = vector.shape_cast %5 : vector<32x1xf32> to vector<32x1xf32>
    %7 = vector.broadcast %6 : vector<32x1xf32> to vector<32x256xf32>
    %8 = vector.extract_strided_slice %0 {offsets = [0, 0], sizes = [1, 256], strides = [1, 1]} : vector<3x256xf32> to vector<1x256xf32>
    %9 = vector.shape_cast %8 : vector<1x256xf32> to vector<1x256xf32>
    %10 = vector.broadcast %9 : vector<1x256xf32> to vector<32x256xf32>
    %11 = arith.mulf %7, %10 : vector<32x256xf32>
    %12 = arith.addf %4, %11 : vector<32x256xf32>
    %13 = vector.extract_strided_slice %1 {offsets = [0, 1], sizes = [32, 1], strides = [1, 1]} : vector<32x3xf32> to vector<32x1xf32>
    %14 = vector.shape_cast %13 : vector<32x1xf32> to vector<32x1xf32>
    %15 = vector.broadcast %14 : vector<32x1xf32> to vector<32x256xf32>
    %16 = vector.extract_strided_slice %0 {offsets = [1, 0], sizes = [1, 256], strides = [1, 1]} : vector<3x256xf32> to vector<1x256xf32>
    %17 = vector.shape_cast %16 : vector<1x256xf32> to vector<1x256xf32>
    %18 = vector.broadcast %17 : vector<1x256xf32> to vector<32x256xf32>
    %19 = arith.mulf %15, %18 : vector<32x256xf32>
    %20 = arith.addf %12, %19 : vector<32x256xf32>
    %21 = vector.extract_strided_slice %1 {offsets = [0, 2], sizes = [32, 1], strides = [1, 1]} : vector<32x3xf32> to vector<32x1xf32>
    %22 = vector.shape_cast %21 : vector<32x1xf32> to vector<32x1xf32>
    %23 = vector.broadcast %22 : vector<32x1xf32> to vector<32x256xf32>
    %24 = vector.extract_strided_slice %0 {offsets = [2, 0], sizes = [1, 256], strides = [1, 1]} : vector<3x256xf32> to vector<1x256xf32>
    %25 = vector.shape_cast %24 : vector<1x256xf32> to vector<1x256xf32>
    %26 = vector.broadcast %25 : vector<1x256xf32> to vector<32x256xf32>
    %27 = arith.mulf %23, %26 : vector<32x256xf32>
    %28 = arith.addf %20, %27 : vector<32x256xf32>
    %29 = math.tanh %28 : vector<32x256xf32>
    %c0_5 = arith.constant 0 : index
    %c0_6 = arith.constant 0 : index
    %c0_7 = arith.constant 0 : index
    %30 = vector.load %arg5[%c0_5, %c0_6, %c0_7] : memref<2x32x32xf32, #tpu.memory_space<vmem>>, vector<1x32x32xf32>
    %31 = vector.shape_cast %30 : vector<1x32x32xf32> to vector<32x32xf32>
    %cst = arith.constant dense<0.000000e+00> : vector<32x256xf32>
    %32 = tpu.matmul %31, %29, %cst {dimension_numbers = #tpu.dot_dimension_numbers<[1], [0], [0], [1], [0, 0, 1, 1], [], []>, precision = #tpu.contract_precision<fp32>} : vector<32x32xf32>, vector<32x256xf32>, vector<32x256xf32> -> vector<32x256xf32>
    %c0_8 = arith.constant 0 : index
    %c0_9 = arith.constant 0 : index
    %c0_10 = arith.constant 0 : index
    %33 = vector.load %arg6[%c0_8, %c0_9, %c0_10] : memref<2x32x1xf32, #tpu.memory_space<vmem>>, vector<1x32x1xf32>
    %34 = vector.shape_cast %33 : vector<1x32x1xf32> to vector<32x1xf32>
    %35 = vector.broadcast %34 : vector<32x1xf32> to vector<32x256xf32>
    %36 = arith.addf %32, %35 : vector<32x256xf32>
    %37 = math.tanh %36 : vector<32x256xf32>
    %cst_11 = arith.constant 5.000000e-01 : f32
    %38 = vector.broadcast %cst_11 : f32 to vector<32x256xf32>
    %39 = arith.mulf %38, %37 : vector<32x256xf32>
    %40 = arith.addf %29, %39 : vector<32x256xf32>
    %c1 = arith.constant 1 : index
    %c0_12 = arith.constant 0 : index
    %c0_13 = arith.constant 0 : index
    %41 = vector.load %arg5[%c1, %c0_12, %c0_13] : memref<2x32x32xf32, #tpu.memory_space<vmem>>, vector<1x32x32xf32>
    %42 = vector.shape_cast %41 : vector<1x32x32xf32> to vector<32x32xf32>
    %cst_14 = arith.constant dense<0.000000e+00> : vector<32x256xf32>
    %43 = tpu.matmul %42, %40, %cst_14 {dimension_numbers = #tpu.dot_dimension_numbers<[1], [0], [0], [1], [0, 0, 1, 1], [], []>, precision = #tpu.contract_precision<fp32>} : vector<32x32xf32>, vector<32x256xf32>, vector<32x256xf32> -> vector<32x256xf32>
    %c1_15 = arith.constant 1 : index
    %c0_16 = arith.constant 0 : index
    %c0_17 = arith.constant 0 : index
    %44 = vector.load %arg6[%c1_15, %c0_16, %c0_17] : memref<2x32x1xf32, #tpu.memory_space<vmem>>, vector<1x32x1xf32>
    %45 = vector.shape_cast %44 : vector<1x32x1xf32> to vector<32x1xf32>
    %46 = vector.broadcast %45 : vector<32x1xf32> to vector<32x256xf32>
    %47 = arith.addf %43, %46 : vector<32x256xf32>
    %48 = math.tanh %47 : vector<32x256xf32>
    %cst_18 = arith.constant 5.000000e-01 : f32
    %49 = vector.broadcast %cst_18 : f32 to vector<32x256xf32>
    %50 = arith.mulf %49, %48 : vector<32x256xf32>
    %51 = arith.addf %40, %50 : vector<32x256xf32>
    %c0_19 = arith.constant 0 : index
    %c0_20 = arith.constant 0 : index
    %52 = vector.load %arg7[%c0_19, %c0_20] : memref<32x1xf32, #tpu.memory_space<vmem>>, vector<32x1xf32>
    %53 = vector.broadcast %52 : vector<32x1xf32> to vector<32x256xf32>
    %54 = arith.mulf %51, %53 : vector<32x256xf32>
    %cst_21 = arith.constant dense<0.000000e+00> : vector<256xf32>
    %55 = vector.multi_reduction <add>, %54, %cst_21 [0] : vector<32x256xf32> to vector<256xf32>
    %56 = vector.shape_cast %55 : vector<256xf32> to vector<1x256xf32>
    %cst_22 = arith.constant 0.000000e+00 : f32
    %57 = vector.broadcast %cst_22 : f32 to vector<1x256xf32>
    %c12 = arith.constant 12 : index
    %58 = memref.load %arg1[%c12] : memref<13xf32, #tpu.memory_space<smem>>
    %59 = vector.broadcast %58 : f32 to vector<1x256xf32>
    %60 = arith.addf %57, %59 : vector<1x256xf32>
    %c9 = arith.constant 9 : index
    %61 = memref.load %arg1[%c9] : memref<13xf32, #tpu.memory_space<smem>>
    %c0_23 = arith.constant 0 : index
    %62 = memref.load %arg1[%c0_23] : memref<13xf32, #tpu.memory_space<smem>>
    %63 = vector.extract_strided_slice %0 {offsets = [0, 0], sizes = [1, 256], strides = [1, 1]} : vector<3x256xf32> to vector<1x256xf32>
    %64 = vector.broadcast %62 : f32 to vector<1x256xf32>
    %65 = arith.mulf %64, %63 : vector<1x256xf32>
    %66 = vector.broadcast %61 : f32 to vector<1x256xf32>
    %67 = arith.addf %66, %65 : vector<1x256xf32>
    %c1_24 = arith.constant 1 : index
    %68 = memref.load %arg1[%c1_24] : memref<13xf32, #tpu.memory_space<smem>>
    %69 = vector.extract_strided_slice %0 {offsets = [1, 0], sizes = [1, 256], strides = [1, 1]} : vector<3x256xf32> to vector<1x256xf32>
    %70 = vector.broadcast %68 : f32 to vector<1x256xf32>
    %71 = arith.mulf %70, %69 : vector<1x256xf32>
    %72 = arith.addf %67, %71 : vector<1x256xf32>
    %c2 = arith.constant 2 : index
    %73 = memref.load %arg1[%c2] : memref<13xf32, #tpu.memory_space<smem>>
    %74 = vector.extract_strided_slice %0 {offsets = [2, 0], sizes = [1, 256], strides = [1, 1]} : vector<3x256xf32> to vector<1x256xf32>
    %75 = vector.broadcast %73 : f32 to vector<1x256xf32>
    %76 = arith.mulf %75, %74 : vector<1x256xf32>
    %77 = arith.addf %72, %76 : vector<1x256xf32>
    %78 = vector.extract_strided_slice %0 {offsets = [0, 0], sizes = [1, 256], strides = [1, 1]} : vector<3x256xf32> to vector<1x256xf32>
    %79 = arith.mulf %78, %77 : vector<1x256xf32>
    %80 = arith.addf %60, %79 : vector<1x256xf32>
    %c10 = arith.constant 10 : index
    %81 = memref.load %arg1[%c10] : memref<13xf32, #tpu.memory_space<smem>>
    %c3 = arith.constant 3 : index
    %82 = memref.load %arg1[%c3] : memref<13xf32, #tpu.memory_space<smem>>
    %83 = vector.extract_strided_slice %0 {offsets = [0, 0], sizes = [1, 256], strides = [1, 1]} : vector<3x256xf32> to vector<1x256xf32>
    %84 = vector.broadcast %82 : f32 to vector<1x256xf32>
    %85 = arith.mulf %84, %83 : vector<1x256xf32>
    %86 = vector.broadcast %81 : f32 to vector<1x256xf32>
    %87 = arith.addf %86, %85 : vector<1x256xf32>
    %c4 = arith.constant 4 : index
    %88 = memref.load %arg1[%c4] : memref<13xf32, #tpu.memory_space<smem>>
    %89 = vector.extract_strided_slice %0 {offsets = [1, 0], sizes = [1, 256], strides = [1, 1]} : vector<3x256xf32> to vector<1x256xf32>
    %90 = vector.broadcast %88 : f32 to vector<1x256xf32>
    %91 = arith.mulf %90, %89 : vector<1x256xf32>
    %92 = arith.addf %87, %91 : vector<1x256xf32>
    %c5 = arith.constant 5 : index
    %93 = memref.load %arg1[%c5] : memref<13xf32, #tpu.memory_space<smem>>
    %94 = vector.extract_strided_slice %0 {offsets = [2, 0], sizes = [1, 256], strides = [1, 1]} : vector<3x256xf32> to vector<1x256xf32>
    %95 = vector.broadcast %93 : f32 to vector<1x256xf32>
    %96 = arith.mulf %95, %94 : vector<1x256xf32>
    %97 = arith.addf %92, %96 : vector<1x256xf32>
    %98 = vector.extract_strided_slice %0 {offsets = [1, 0], sizes = [1, 256], strides = [1, 1]} : vector<3x256xf32> to vector<1x256xf32>
    %99 = arith.mulf %98, %97 : vector<1x256xf32>
    %100 = arith.addf %80, %99 : vector<1x256xf32>
    %c11 = arith.constant 11 : index
    %101 = memref.load %arg1[%c11] : memref<13xf32, #tpu.memory_space<smem>>
    %c6 = arith.constant 6 : index
    %102 = memref.load %arg1[%c6] : memref<13xf32, #tpu.memory_space<smem>>
    %103 = vector.extract_strided_slice %0 {offsets = [0, 0], sizes = [1, 256], strides = [1, 1]} : vector<3x256xf32> to vector<1x256xf32>
    %104 = vector.broadcast %102 : f32 to vector<1x256xf32>
    %105 = arith.mulf %104, %103 : vector<1x256xf32>
    %106 = vector.broadcast %101 : f32 to vector<1x256xf32>
    %107 = arith.addf %106, %105 : vector<1x256xf32>
    %c7 = arith.constant 7 : index
    %108 = memref.load %arg1[%c7] : memref<13xf32, #tpu.memory_space<smem>>
    %109 = vector.extract_strided_slice %0 {offsets = [1, 0], sizes = [1, 256], strides = [1, 1]} : vector<3x256xf32> to vector<1x256xf32>
    %110 = vector.broadcast %108 : f32 to vector<1x256xf32>
    %111 = arith.mulf %110, %109 : vector<1x256xf32>
    %112 = arith.addf %107, %111 : vector<1x256xf32>
    %c8 = arith.constant 8 : index
    %113 = memref.load %arg1[%c8] : memref<13xf32, #tpu.memory_space<smem>>
    %114 = vector.extract_strided_slice %0 {offsets = [2, 0], sizes = [1, 256], strides = [1, 1]} : vector<3x256xf32> to vector<1x256xf32>
    %115 = vector.broadcast %113 : f32 to vector<1x256xf32>
    %116 = arith.mulf %115, %114 : vector<1x256xf32>
    %117 = arith.addf %112, %116 : vector<1x256xf32>
    %118 = vector.extract_strided_slice %0 {offsets = [2, 0], sizes = [1, 256], strides = [1, 1]} : vector<3x256xf32> to vector<1x256xf32>
    %119 = arith.mulf %118, %117 : vector<1x256xf32>
    %120 = arith.addf %100, %119 : vector<1x256xf32>
    %121 = arith.addf %56, %120 : vector<1x256xf32>
    %c0_25 = arith.constant 0 : index
    %c0_26 = arith.constant 0 : index
    %122 = vector.load %arg8[%c0_25, %c0_26] : memref<1x256xf32, #tpu.memory_space<vmem>>, vector<1x256xf32>
    tpu.vector_store %arg8[%c0_25, %c0_26], %121 {strides = array<i32>} : memref<1x256xf32, #tpu.memory_space<vmem>>, vector<1x256xf32>,
    return
  }
  func.func @transform_0(%arg0: i32, %arg1: memref<13xf32, #tpu.memory_space<smem>>) -> (i32, i32) {
    %c0_i32 = arith.constant 0 : i32
    %c0_i32_0 = arith.constant 0 : i32
    return %c0_i32, %arg0 : i32, i32
  }
  func.func @transform_1(%arg0: i32, %arg1: memref<13xf32, #tpu.memory_space<smem>>) -> (i32, i32) {
    %c0_i32 = arith.constant 0 : i32
    %c0_i32_0 = arith.constant 0 : i32
    %c0_i32_1 = arith.constant 0 : i32
    return %c0_i32, %c0_i32_0 : i32, i32
  }
  func.func @transform_2(%arg0: i32, %arg1: memref<13xf32, #tpu.memory_space<smem>>) -> (i32, i32) {
    %c0_i32 = arith.constant 0 : i32
    %c0_i32_0 = arith.constant 0 : i32
    %c0_i32_1 = arith.constant 0 : i32
    return %c0_i32, %c0_i32_0 : i32, i32
  }
  func.func @transform_3(%arg0: i32, %arg1: memref<13xf32, #tpu.memory_space<smem>>) -> (i32, i32, i32) {
    %c0_i32 = arith.constant 0 : i32
    %c0_i32_0 = arith.constant 0 : i32
    %c0_i32_1 = arith.constant 0 : i32
    %c0_i32_2 = arith.constant 0 : i32
    return %c0_i32, %c0_i32_0, %c0_i32_1 : i32, i32, i32
  }
  func.func @transform_4(%arg0: i32, %arg1: memref<13xf32, #tpu.memory_space<smem>>) -> (i32, i32, i32) {
    %c0_i32 = arith.constant 0 : i32
    %c0_i32_0 = arith.constant 0 : i32
    %c0_i32_1 = arith.constant 0 : i32
    %c0_i32_2 = arith.constant 0 : i32
    return %c0_i32, %c0_i32_0, %c0_i32_1 : i32, i32, i32
  }
  func.func @transform_5(%arg0: i32, %arg1: memref<13xf32, #tpu.memory_space<smem>>) -> (i32, i32) {
    %c0_i32 = arith.constant 0 : i32
    %c0_i32_0 = arith.constant 0 : i32
    %c0_i32_1 = arith.constant 0 : i32
    return %c0_i32, %c0_i32_0 : i32, i32
  }
  func.func @transform_6(%arg0: i32, %arg1: memref<13xf32, #tpu.memory_space<smem>>) -> (i32, i32) {
    %c0_i32 = arith.constant 0 : i32
    %c0_i32_0 = arith.constant 0 : i32
    return %c0_i32, %arg0 : i32, i32
  }
}

</mosaic_0001>

<bundles_post_ra>
// kernel: tpu_custom_call.1
= control target key start
LH: loop header
LB: loop body
LE: loop exit
PB: predicated region body
PF: predicated region fallthrough
CT: control target
= control target key end

     0   :  { %s3430_s0 = inlined_call_operand.vmem [shape: f32[13], index: 0, kind: input, shape index: {}]   ;;  %s3431_s1 = inlined_call_operand.vmem [shape: f32[3,1024], index: 1, kind: input, shape index: {}]   ;;  %s3432_s2 = inlined_call_operand.vmem [shape: f32[32,3], index: 2, kind: input, shape index: {}]   ;;  %s3433_s3 = inlined_call_operand.vmem [shape: f32[32,1], index: 3, kind: input, shape index: {}]   ;;  %s3434_s4 = inlined_call_operand.vmem [shape: f32[2,32,32], index: 4, kind: input, shape index: {}]   ;;  %s3435_s5 = inlined_call_operand.vmem [shape: f32[2,32,1], index: 5, kind: input, shape index: {}]   ;;  %s3436_s6 = inlined_call_operand.vmem [shape: f32[32,1], index: 6, kind: input, shape index: {}]   ;;  %s3437_s7 = inlined_call_operand.hbm [shape: f32[1,1024], index: 7, kind: output, shape index: {}]  }
   0x1   :  { %s12_s26 = sshll.u32 %s3430_s0, 4  ;;  %s13_s26 = int_to_ptr.vmem [resolvable:$true] %s12_s26 }
   0x2   :  { %s2550_s27 = scalar_lea.vmem %s13_s26, 16  ;;  %p2555_p1 = scmp.lt.s32.totalorder %s13_s26, %s13_s26 }
   0x3   :  { %p2551_p0 = scmp.ne.s32.totalorder %s13_s26, %s2550_s27  ;;  %p2556_p2 = scmp.lt.s32.totalorder %s2550_s27, %s2550_s27 }
   0x5   :  { %p2557_p3 = por %p2556_p2, %p2555_p1 }
   0x7   :  { %p2558_p4 = pnand %p2557_p3, %p2551_p0 }
   0x9   :  { %2561 = shalt.err (!%p2558_p4)  }
   0xa   :  { %s2628_s28 = smov [#allocation3]  }
   0xb   :  { %15 = dma.vmem_to_smem %s13_s26, 16, %s2628_s28, [#allocation2] }
   0xc   :  { %2606 = dma.done.wait [#allocation2], 16 }
   0xd   :  { %2607 = vsyncadd [#allocation2], 4294967280 }
   0xe   :  { %17 = sfence }
   0xf   :  { %18 = vsyncpa [#allocation5], 0 }
  0x10   :  { %20 = vsyncpa [#allocation5 + $0x1], 0  ;;  %s2678_s29 = smov 0   ;;  %s2680_s30 = smov 0  }
  0x11   :  { %s2682_s0 = smov 0   ;;  %s2684_s8 = smov 0  }
  0x12 LB: > { %3444 = sst [smem:[#allocation8_spill]] %s2614_s29  ;;  %s2699_s9 = sadd.s32 4294967295, %s2626_s8   ;;  %s2626_s8 = sphi %s2684_s8, %s3456_s8   ;;  %s2622_s0 = sphi %s2682_s0, %s3458_s0   ;;  %s2618_s30 = sphi %s2680_s30, %s3460_s30   ;;  %s2614_s29 = sphi %s2678_s29, %s3459_s29  }
  0x13   : > { %3445 = sst [smem:[#allocation9_spill]] %s2622_s0  ;;  %s2212_s10 = sadd.s32 4294967294, %s2626_s8  }
  0x14   : > { %3446 = sst [smem:[#allocation10_spill]] %s2626_s8  ;;  %s2703_s11 = sadd.s32 1, %s2626_s8  }
  0x15   : > { %3447 = sst [smem:[#allocation11_spill]] %s2703_s11  ;;  %s164_s12 = sadd.s32 1, %s2622_s0 }
  0x16   : > { %s161_s13 = ssub.s32 %s2626_s8, %s2703_s11  ;;  %p174_p5 = scmp.ne.s32.totalorder %s2622_s0, %s2618_s30 }
  0x17   : > { %p162_p6 = scmp.eq.s32.totalorder %s161_s13, 0  ;;  %p175_p7 = scmp.eq.s32.totalorder %s2699_s9, 3 }
  0x18   : > { %p180_p8 = scmp.ne.s32.totalorder %s2618_s30, %s2614_s29  ;;  %p181_p9 = scmp.eq.s32.totalorder %s2212_s10, 3 }
  0x19   : > { %s2714_s14 = scalar_select %p162_p6, %s2622_s0, %s164_s12  }
  0x1a   : > { %p2716_p10 = por %p175_p7, %p174_p5  ;;  %p2720_p11 = por %p181_p9, %p180_p8 }
  0x1b   : > { %3448 = sst [smem:[#allocation12_spill]] %s2714_s14  ;;  %p2215_p12 = scmp.ge.s32.totalorder %s2626_s8, 1 }
  0x1c   : > { %s3450_s16 = scalar_select %p2720_p11, 1, 0 }
  0x1d   : > { %p223_p13 = scmp.lt.s32.totalorder %s2626_s8, 5 }
  0x1e   : > { %3451 = sst [smem:[#allocation13_spill]] %s3450_s16 }
  0x1f   : > { %p224_p0 = pnand %p2215_p12, %p223_p13 }
  0x20   : > { %v265_v0 = vld [vmem:[%s3433_s3] sm:$0xff] (!%p224_p0)  ;;  %v2629_v2 = vmov (!%p224_p0), 0   ;;  %s2217_s21 = sshll.u32 (!%p224_p0), %s2699_s9, 1  ;;  %s2738_s22 = sld [smem:[#allocation3 + $0x9]] (!%p224_p0)  ;;  %v266_v3 = vld [vmem:[%s3433_s3 + $0x8] sm:$0xff] (!%p224_p0)  ;;  %v2770_v5 = vld [vmem:[%s3432_s2 + $0x18] sm:$0xff] (!%p224_p0)  ;;  %v310_v49 = vlaneseq (!%p224_p0) }
  0x21   : > { %227 = sbr.rel (%p224_p0) target bundleno = 914 (0x392), region = 44  ;;  %v2732_v1 = vld [vmem:[%s3432_s2] sm:$0xff] (!%p224_p0)  ;;  %2491 = vset.pattern.permute.xlu1 (!%p224_p0), %v2629_v2  ;;  %2490 = vset.pattern.permute.xlu0 (!%p224_p0), %v2629_v2  ;;  %p2740_p1 = scmp.lt.s32.totalorder (!%p224_p0), %s2217_s21, 7  ;;  %v2750_v4 = vld [vmem:[%s3432_s2 + $0x8] sm:$0xff] (!%p224_p0)  ;;  %v2630_v6 = vmov (!%p224_p0), 1   ;;  %v267_v7 = vld [vmem:[%s3433_s3 + $0x10] sm:$0xff] (!%p224_p0) }
  0x22   : > { %271 = vperm.xlu1 (!%p224_p0), %2491, %v265_v0   ;;  %291 = vperm.xlu0 (!%p224_p0), %2490, %v2732_v1   ;;  %s2752_s28 = sld [smem:[#allocation3]] (!%p224_p0)  ;;  %s2754_s10 = sld [smem:[#allocation3 + $0x1]] (!%p224_p0)  ;;  %v2791_v8 = vld [vmem:[%s3432_s2 + $0x10] sm:$0xff] (!%p224_p0)  ;;  %v2631_v39 = vmov (!%p224_p0), 2   ;;  %v268_v54 = vld [vmem:[%s3433_s3 + $0x18] sm:$0xff] (!%p224_p0)  ;;  %v2836_v56 = vshrl.u32 (!%p224_p0), %v310_v49, 7 }
  0x23   : > { %s2756_s12 = sld [smem:[#allocation3 + $0x2]] (!%p224_p0)  ;;  %s2760_s17 = sld [smem:[#allocation3 + $0x3]] (!%p224_p0)  ;;  %v2632_v63 = vmov (!%p224_p0), 0.0   ;;  %vm480_vm0 = vcmask (!%p224_p0), 261120   ;;  %vm2135_vm1 = vcmp.lt.s32.totalorder (!%p224_p0), %v310_v49, 256 }
  0x24   : > { %s2758_s13 = sld [smem:[#allocation3 + $0xa]] (!%p224_p0)  ;;  %s2762_s18 = sld [smem:[#allocation3 + $0x4]] (!%p224_p0)  ;;  %v316_v60 = vsub.s32 (!%p224_p0), 4, %v2836_v56  ;;  %565 = vmatprep.mubr.f32.mxu0 (!%p224_p0), %v2632_v63  ;;  %1321 = vmatprep.mubr.f32.mxu1 (!%p224_p0), %v2632_v63 }
  0x25   : > { %s2765_s19 = sld [smem:[#allocation3 + $0x5]] (!%p224_p0)  ;;  %s2772_s25 = sld [smem:[#allocation3 + $0x6]] (!%p224_p0) }
  0x26   : > { %276 = vperm.xlu1 (!%p224_p0), %2491, %v266_v3   ;;  %296 = vperm.xlu0 (!%p224_p0), %2490, %v2750_v4   ;;  %s2774_s26 = sld [smem:[#allocation3 + $0x7]] (!%p224_p0)  ;;  %s2776_s27 = sld [smem:[#allocation3 + $0xb]] (!%p224_p0)  ;;  %v2020_v14 = vstv (!%p224_p0), %s2738_s22  ;;  %v2854_v3 = vsub.s32 (!%p224_p0), 0, %v2836_v56 }
  0x27   : > { %s2778_s14 = sld [smem:[#allocation3 + $0x8]] (!%p224_p0)  ;;  %s2806_s0 = sld [smem:[#allocation3 + $0xc]] (!%p224_p0) }
  0x28   : > { %s3462_s21 = smov (!%p2740_p1, %s2217_s21), 7  ;;  %v2018_v9 = vstv %s2752_s28  ;;  %v2023_v10 = vstv %s2754_s10  ;;  %s250_s29 = sand.u32 1, %s2618_s30  }
  0x29   : > { %s2218_s23 = sshll.u32 %s3462_s21, 2  ;;  %v2031_v11 = vstv %s2756_s12  ;;  %v2042_v12 = vstv %s2760_s17  ;;  %s2252_s11 = sshll.u32 %s2699_s9, 5 }
  0x2a   : > { %2492 = vset.pattern.permute.xlu1 %v2630_v6  ;;  %306 = vperm.xlu0 %2490, %v2770_v5   ;;  %v2047_v13 = vstv %s2762_s18  ;;  %s257_s8 = scalar_lea.vmem %s3431_s1, %s2218_s23  ;;  %v2044_v15 = vstv %s2758_s13  ;;  %s3388_s28 = scalar_lea.hbm %s3437_s7, %s2252_s11 }
  0x2b   : > { %349 = vperm.xlu1 %2492, %v2750_v4   ;;  %v2055_v16 = vstv %s2765_s19  ;;  %v2804_v17 = vld [vmem:[%s257_s8] sm:$0x77]  ;;  %v2073_v18 = vstv %s2772_s25  ;;  %s2216_s8 = sshll.u32 %s250_s29, 1  ;;  %s2139_s10 = scalar_lea.sflag [#allocation5], %s250_s29 }
  0x2c   : > { %v2078_v19 = vstv %s2774_s26  ;;  %v2019_v21 = vmul.f32 %v2018_v9, %v2804_v17  ;;  %v2024_v22 = vmul.f32 %v2023_v10, %v2804_v17  ;;  %v2032_v23 = vmul.f32 %v2031_v11, %v2804_v17  ;;  %s2634_s9 = smov [#allocation4]  }
  0x2d   : > { %v2086_v20 = vstv %s2778_s14  ;;  %v2043_v24 = vmul.f32 %v2042_v12, %v2804_v17  ;;  %v2048_v25 = vmul.f32 %v2047_v13, %v2804_v17  ;;  %v2075_v26 = vstv %s2776_s27  ;;  %s252_s14 = scalar_lea.vmem [#allocation4], %s2216_s8  ;;  %s2566_s13 = sshll.u32 %s2634_s9, 4  ;;  %s2567_s13 = int_to_ptr.vmem [resolvable:$false] %s2566_s13 }
  0x2e   : > { %281 = vperm.xlu0 %2490, %v267_v7   ;;  %v2021_v27 = vadd.f32 %v2020_v14, %v2019_v21  ;;  %v2056_v28 = vmul.f32 %v2055_v16, %v2804_v17  ;;  %v2230_v29 = vrot.slane %v2024_v22, 9  ;;  %v2232_v30 = vrot.slane %v2032_v23, 10  ;;  %s2153_s16 = sshll.u32 %s252_s14, 4  ;;  %s2568_s17 = scalar_lea.vmem %s2567_s13, 64  ;;  %s3390_s16 = int_to_ptr.vmem [resolvable:$true] %s2153_s16 }
  0x2f   : > { %2493 = vset.pattern.permute.xlu1 %v2629_v2  ;;  %v2045_v31 = vadd.f32 %v2044_v15, %v2043_v24  ;;  %v2236_v32 = vrot.slane %v2048_v25, 9  ;;  %v2074_v34 = vmul.f32 %v2073_v18, %v2804_v17  ;;  %v2079_v35 = vmul.f32 %v2078_v19, %v2804_v17  ;;  %s2562_s12 = scalar_lea.vmem %s3390_s16, 32  ;;  %p2569_p5 = scmp.lt.s32.totalorder %s3390_s16, %s2567_s13 }
  0x30   : > { %301 = vperm.xlu1 %2493, %v2791_v8   ;;  %v2238_v33 = vrot.slane %v2056_v28, 10  ;;  %v2087_v36 = vmul.f32 %v2086_v20, %v2804_v17  ;;  %v2029_v37 = vadd.f32 %v2230_v29, %v2021_v27  ;;  %v2014_v45 = vstv %s2806_s0  ;;  %p2563_p2 = scmp.ne.s32.totalorder %s3390_s16, %s2562_s12  ;;  %p2570_p6 = scmp.lt.s32.totalorder %s2568_s17, %s2562_s12 }
  0x31   : > { %v2053_v38 = vadd.f32 %v2236_v32, %v2045_v31  ;;  %v2076_v40 = vadd.f32 %v2075_v26, %v2074_v34  ;;  %v2243_v41 = vrot.slane %v2079_v35, 9  ;;  %v317_v7 = vrot.slane %v2804_v17, %v316_v60 }
  0x32   : > { %2495 = vset.pattern.permute.xlu0 %v2630_v6  ;;  %v2245_v42 = vrot.slane %v2087_v36, 10  ;;  %v2037_v43 = vadd.f32 %v2232_v30, %v2029_v37  ;;  %v366_v9 = vsub.s32 5, %v2836_v56  ;;  %v412_v10 = vsub.s32 2, %v2836_v56  ;;  %p2564_p3 = pnand %p2563_p2, %p2716_p10  ;;  %p2571_p7 = por %p2570_p6, %p2569_p5 }
  0x33   : > { %345 = vperm.xlu0 %2495, %v2732_v1   ;;  %v2061_v44 = vadd.f32 %v2238_v33, %v2053_v38  ;;  %v2084_v46 = vadd.f32 %v2243_v41, %v2076_v40  ;;  %v416_v11 = vsub.s32 6, %v2836_v56  ;;  %v327_v14 = vrot.slane %v317_v7, %v2854_v3 }
  0x34   : > { %2494 = vset.pattern.permute.xlu1 %v2631_v39  ;;  %v2038_v47 = vmul.f32 %v2037_v43, %v2804_v17  ;;  %v367_v16 = vrot.slane %v2804_v17, %v366_v9  ;;  %v413_v19 = vrot.slane %v2804_v17, %v412_v10  ;;  %p2565_p4 = pneg %p2564_p3 }
  0x35   : > { %395 = vperm.xlu1 %2494, %v2732_v1   ;;  %v2063_v48 = vrot.slane %v2061_v44, 7  ;;  %v2092_v50 = vadd.f32 %v2245_v42, %v2084_v46  ;;  %v417_v20 = vrot.slane %v2804_v17, %v416_v11 }
  0x36   : > { %v2039_v51 = vadd.f32 %v2038_v47, %v2014_v45  ;;  %v2871_v26 = vrot.slane %v413_v19, %v412_v10  ;;  %p2572_p8 = pnand %p2571_p7, %p2565_p4 }
  0x37   : > { %353 = vperm.xlu0 %2495, %v2791_v8   ;;  %v2065_v52 = vmul.f32 %v2063_v48, %v2804_v17  ;;  %v2094_v53 = vrot.slane %v2092_v50, 6  ;;  %v2873_v27 = vrot.slane %v417_v20, %v412_v10 }
  0x39   : > { %399 = vperm.xlu1 %2494, %v2750_v4   ;;  %v2239_v55 = vrot.slane %v2065_v52, 9  ;;  %v2096_v57 = vmul.f32 %v2094_v53, %v2804_v17 }
  0x3b   : > { %2499 = vset.pattern.permute.xlu0 %v2631_v39  ;;  %v2070_v58 = vadd.f32 %v2239_v55, %v2039_v51  ;;  %v2246_v59 = vrot.slane %v2096_v57, 10  ;;  %v452_v57 = vld [vmem:[%s3434_s4] sm:$0xff] }
  0x3c   : > { %407 = vperm.xlu0 %2499, %v2770_v5  }
  0x3d   : > { %2496 = vset.pattern.permute.xlu1 %v2629_v2  ;;  %v2841_v61 = vadd.f32 %v2246_v59, %v2070_v58  ;;  %v458_v58 = vld [vmem:[%s3435_s5 + $0x10] sm:$0xff]  ;;  %v457_v59 = vld [vmem:[%s3435_s5 + $0x8] sm:$0xff] }
  0x3e   : > { %286 = vperm.xlu1 %2496, %v268_v54   ;;  %v456_v54 = vld [vmem:[%s3435_s5] sm:$0xff] }
  0x3f   : > { %v2846_v62 = vrot.slane %v2841_v61, %v316_v60 }
  0x40   : > { %2501 = vset.pattern.permute.xlu0 %v2629_v2 }
  0x41   : > { %472 = vperm.xlu0 %2501, %v458_v58  }
  0x42   : > { %2497 = vset.pattern.permute.xlu1 %v2630_v6 }
  0x43   : > { %357 = vperm.xlu1 %2497, %v2770_v5   ;;  %v313_v5 = vrot.slane %v2804_v17, %v2854_v3 }
  0x45   : > { %v323_v12 = vrot.slane %v313_v5, %v2854_v3 }
  0x47   : > { %2498 = vset.pattern.permute.xlu1 %v2631_v39 }
  0x48   : > { %403 = vperm.xlu1 %2498, %v2791_v8   ;;  %v362_v8 = vsub.s32 1, %v2836_v56 }
  0x4a   : > { %v363_v15 = vrot.slane %v2804_v17, %v362_v8  ;;  %v377_v25 = vrot.slane %v367_v16, %v362_v8 }
  0x4c   : > { %2500 = vset.pattern.permute.xlu1 %v2629_v2  ;;  %v373_v24 = vrot.slane %v363_v15, %v362_v8  ;;  %v459_v15 = vld [vmem:[%s3435_s5 + $0x18] sm:$0xff] }
  0x4d   : > { %462 = vperm.xlu1 %2500, %v456_v54  }
  0x51   : > { %467 = vperm.xlu1 %2500, %v457_v59  }
  0x55   : > { %477 = vperm.xlu1 %2500, %v459_v15  }
  0xa1   : > { %v272_v0 = vpop.permute.xlu1 %271  ;;  %v292_v1 = vpop.permute.xlu0 %291 }
  0xa2   : > { %v328_v21 = vmul.f32 %v323_v12, %v292_v1  ;;  %v329_v22 = vmul.f32 %v327_v14, %v292_v1  ;;  %v482_v1 = vsel %vm480_vm0, %v452_v57, 0 }
  0xa4   : > { %v336_v28 = vadd.f32 %v328_v21, %v272_v0  ;;  %v337_v30 = vadd.f32 %v329_v22, %v272_v0  ;;  %v2224_v0 = vld [vmem:[%s3435_s5 + $0x28] sm:$0xff] }
  0xa5   : > { %v277_v4 = vpop.permute.xlu1 %276  ;;  %v297_v6 = vpop.permute.xlu0 %296  ;;  %1224 = vperm.xlu0 %2501, %v2224_v0  }
  0xa6   : > { %v330_v31 = vmul.f32 %v323_v12, %v297_v6  ;;  %v331_v34 = vmul.f32 %v327_v14, %v297_v6 }
  0xa8   : > { %v338_v41 = vadd.f32 %v330_v31, %v277_v4  ;;  %v339_v43 = vadd.f32 %v331_v34, %v277_v4 }
  0xa9   : > { %v307_v2 = vpop.permute.xlu0 %306 }
  0xaa   : > { %v350_v13 = vpop.permute.xlu1 %349  ;;  %v334_v4 = vmul.f32 %v323_v12, %v307_v2  ;;  %v335_v6 = vmul.f32 %v327_v14, %v307_v2  ;;  %v2226_v2 = vld [vmem:[%s3435_s5 + $0x38] sm:$0xff] }
  0xab   : > { %v380_v35 = vmul.f32 %v373_v24, %v350_v13  ;;  %v381_v40 = vmul.f32 %v377_v25, %v350_v13  ;;  %1234 = vperm.xlu0 %2501, %v2226_v2  }
  0xad   : > { %v2867_v18 = vpop.permute.xlu0 %281  ;;  %v388_v46 = vadd.f32 %v380_v35, %v338_v41  ;;  %v389_v48 = vadd.f32 %v381_v40, %v339_v43  ;;  %v453_v40 = vld [vmem:[%s3434_s4 + $0x8] sm:$0xff] }
  0xaf   : > { %v302_v23 = vpop.permute.xlu1 %301 }
  0xb0   : > { %v332_v5 = vmul.f32 %v323_v12, %v302_v23  ;;  %v333_v7 = vmul.f32 %v327_v14, %v302_v23  ;;  %v2903_v12 = vand.u32 4294901760, %v482_v1 }
  0xb2   : > { %v346_v29 = vpop.permute.xlu0 %345  ;;  %v340_v22 = vadd.f32 %v332_v5, %v2867_v18  ;;  %v341_v23 = vadd.f32 %v333_v7, %v2867_v18  ;;  %v1964_v18 = vld [vmem:[%s3436_s6 + $0x8] sm:$0xff]  ;;  %v2931_v43 = vsub.f32 %v482_v1, %v2903_v12  ;;  %v1965_v5 = vld [vmem:[%s3436_s6 + $0x10] sm:$0xff] }
  0xb3   : > { %v378_v32 = vmul.f32 %v373_v24, %v346_v29  ;;  %v379_v33 = vmul.f32 %v377_v25, %v346_v29  ;;  %1974 = vperm.xlu0 %2501, %v1964_v18  }
  0xb4   : > { %v396_v36 = vpop.permute.xlu1 %395 }
  0xb5   : > { %v386_v37 = vadd.f32 %v378_v32, %v336_v28  ;;  %v387_v17 = vadd.f32 %v379_v33, %v337_v30  ;;  %v428_v38 = vmul.f32 %v2871_v26, %v396_v36  ;;  %v429_v39 = vmul.f32 %v2873_v27, %v396_v36 }
  0xb6   : > { %v354_v51 = vpop.permute.xlu0 %353 }
  0xb7   : > { %v436_v42 = vadd.f32 %v428_v38, %v386_v37  ;;  %v437_v44 = vadd.f32 %v429_v39, %v387_v17  ;;  %v382_v8 = vmul.f32 %v373_v24, %v354_v51  ;;  %v383_v9 = vmul.f32 %v377_v25, %v354_v51  ;;  %v454_v51 = vld [vmem:[%s3434_s4 + $0x10] sm:$0xff] }
  0xb8   : > { %v400_v45 = vpop.permute.xlu1 %399  ;;  %v488_v59 = vsel %vm480_vm0, %v454_v51, 0 }
  0xb9   : > { %v430_v47 = vmul.f32 %v2871_v26, %v400_v45  ;;  %v431_v50 = vmul.f32 %v2873_v27, %v400_v45  ;;  %2502 = vtanh.f32 %v436_v42  ;;  %v390_v31 = vadd.f32 %v382_v8, %v340_v22  ;;  %v2225_v45 = vld [vmem:[%s3435_s5 + $0x30] sm:$0xff] }
  0xba   : > { %2504 = vtanh.f32 %v437_v44  ;;  %v391_v32 = vadd.f32 %v383_v9, %v341_v23  ;;  %v2985_v9 = vand.u32 4294901760, %v488_v59 }
  0xbb   : > { %v438_v52 = vadd.f32 %v430_v47, %v388_v46  ;;  %v439_v53 = vadd.f32 %v431_v50, %v389_v48  ;;  %v408_v60 = vpop.permute.xlu0 %407  ;;  %v485_v47 = vsel %vm480_vm0, %v453_v40, 0  ;;  %v1966_v48 = vld [vmem:[%s3436_s6 + $0x18] sm:$0xff] }
  0xbc   : > { %v434_v11 = vmul.f32 %v2871_v26, %v408_v60  ;;  %v435_v13 = vmul.f32 %v2873_v27, %v408_v60  ;;  %v2956_v54 = vand.u32 4294901760, %v485_v47  ;;  %1984 = vperm.xlu0 %2501, %v1966_v48  }
  0xbd   : > { %2506 = vtanh.f32 %v438_v52  ;;  %v287_v55 = vpop.permute.xlu1 %286 }
  0xbe   : > { %2508 = vtanh.f32 %v439_v53  ;;  %v342_v16 = vadd.f32 %v334_v4, %v287_v55  ;;  %v343_v19 = vadd.f32 %v335_v6, %v287_v55  ;;  %v568_v53 = vand.u32 4294901760, %v2931_v43  ;;  %v1963_v55 = vld [vmem:[%s3436_s6] sm:$0xff]  ;;  %v455_v6 = vld [vmem:[%s3434_s4 + $0x18] sm:$0xff] }
  0xbf   : > { %v2974_v4 = vsub.f32 %v485_v47, %v2956_v54 }
  0xc0   : > { %v569_v1 = vsub.f32 %v2931_v43, %v568_v53 }
  0xc1   : > { %v579_v23 = vand.u32 4294901760, %v2974_v4 }
  0xc2   : > { %v358_v10 = vpop.permute.xlu1 %357  ;;  %v570_v22 = vand.u32 4294901760, %v569_v1 }
  0xc3   : > { %v384_v20 = vmul.f32 %v373_v24, %v358_v10  ;;  %v385_v21 = vmul.f32 %v377_v25, %v358_v10  ;;  %v2905_v14 = vpop.eup %2502  ;;  %v2223_v24 = vld [vmem:[%s3435_s5 + $0x20] sm:$0xff] }
  0xc4   : > { %v2909_v30 = vpop.eup %2504  ;;  %v495_v38 = vand.u32 4294901760, %v2905_v14  ;;  %1219 = vperm.xlu1 %2500, %v2223_v24  }
  0xc5   : > { %v392_v28 = vadd.f32 %v384_v20, %v342_v16  ;;  %v393_v29 = vadd.f32 %v385_v21, %v343_v19  ;;  %v493_v41 = vand.u32 4294901760, %v2909_v30  ;;  %v491_v19 = vsel %vm480_vm0, %v455_v6, 0 }
  0xc6   : > { %v2967_v60 = vsub.f32 %v2905_v14, %v495_v38  ;;  %v3019_v18 = vand.u32 4294901760, %v491_v19 }
  0xc7   : > { %v2914_v25 = vpop.eup %2506  ;;  %v442_v33 = vadd.f32 %v434_v11, %v392_v28  ;;  %v443_v34 = vadd.f32 %v435_v13, %v393_v29  ;;  %v404_v35 = vpop.permute.xlu1 %403  ;;  %v2952_v52 = vsub.f32 %v2909_v30, %v493_v41 }
  0xc8   : > { %v2919_v36 = vpop.eup %2508  ;;  %v432_v37 = vmul.f32 %v2871_v26, %v404_v35  ;;  %v433_v17 = vmul.f32 %v2873_v27, %v404_v35  ;;  %v499_v39 = vand.u32 4294901760, %v2914_v25  ;;  %1229 = vperm.xlu1 %2500, %v2225_v45   ;;  %v618_v16 = vand.u32 4294901760, %v2967_v60 }
  0xc9   : > { %2510 = vtanh.f32 %v442_v33  ;;  %v497_v42 = vand.u32 4294901760, %v2919_v36  ;;  %v612_v0 = vand.u32 4294901760, %v2952_v52  ;;  %v3049_v1 = vsub.f32 %v491_v19, %v3019_v18 }
  0xca   : > { %2512 = vtanh.f32 %v443_v34  ;;  %v440_v26 = vadd.f32 %v432_v37, %v390_v31  ;;  %v441_v27 = vadd.f32 %v433_v17, %v391_v32  ;;  %v2933_v44 = vpack.c.bf16 %v499_v39, %v495_v38 }
  0xcb   : > { %v2938_v46 = vpack.c.bf16 %v497_v42, %v493_v41  ;;  %v2945_v50 = vsub.f32 %v2919_v36, %v497_v42  ;;  %v2962_v57 = vsub.f32 %v2914_v25, %v499_v39  ;;  %v613_v2 = vsub.f32 %v2952_v52, %v612_v0 }
  0xcc   : > { %2514 = vtanh.f32 %v440_v26  ;;  %1969 = vperm.xlu1 %2500, %v1963_v55   ;;  %v3015_v32 = vsub.f32 %v488_v59, %v2985_v9  ;;  %v619_v38 = vsub.f32 %v2967_v60, %v618_v16  ;;  %v580_v26 = vsub.f32 %v2974_v4, %v579_v23 }
  0xcd   : > { %2516 = vtanh.f32 %v441_v27  ;;  %2254 = vmatprep.subr.bf16.mxu0 %v2938_v46  ;;  %v624_v58 = vand.u32 4294901760, %v2945_v50  ;;  %v630_v8 = vand.u32 4294901760, %v2962_v57  ;;  %v614_v42 = vand.u32 4294901760, %v613_v2 }
  0xce   : > { %2256 = vmatpush1.bf16.msra.mxu0 %v2933_v44  ;;  %v590_v48 = vand.u32 4294901760, %v3015_v32  ;;  %v620_v6 = vand.u32 4294901760, %v619_v38 }
  0xcf   : > { %v625_v13 = vsub.f32 %v2945_v50, %v624_v58  ;;  %v631_v31 = vsub.f32 %v2962_v57, %v630_v8 }
  0xd0   : > { %1979 = vperm.xlu1 %2500, %v1965_v5  }
  0xd1   : > { %v626_v34 = vand.u32 4294901760, %v625_v13  ;;  %v632_v27 = vand.u32 4294901760, %v631_v31 }
  0xd3   : > { %v2982_v7 = vpop.eup %2510  ;;  %v2261_v51 = vpack.c.bf16 %v626_v34, %v614_v42  ;;  %v2263_v13 = vpack.c.bf16 %v632_v27, %v620_v6  ;;  %v601_v34 = vand.u32 4294901760, %v3049_v1 }
  0xd4   : > { %v2987_v10 = vpop.eup %2512  ;;  %v507_v11 = vand.u32 4294901760, %v2982_v7 }
  0xd5   : > { %v505_v15 = vand.u32 4294901760, %v2987_v10 }
  0xd6   : > { %v2996_v20 = vpop.eup %2514  ;;  %v2999_v21 = vsub.f32 %v2982_v7, %v507_v11 }
  0xd7   : > { %v3005_v28 = vpop.eup %2516  ;;  %v3008_v29 = vsub.f32 %v2987_v10, %v505_v15  ;;  %v503_v24 = vand.u32 4294901760, %v2996_v20 }
  0xd8   : > { %v501_v33 = vand.u32 4294901760, %v3005_v28  ;;  %v654_v35 = vand.u32 4294901760, %v2999_v21 }
  0xd9   : > { %v3021_v37 = vpack.c.bf16 %v507_v11, %v503_v24  ;;  %v3024_v17 = vsub.f32 %v2996_v20, %v503_v24  ;;  %v648_v39 = vand.u32 4294901760, %v3008_v29 }
  0xda   : > { %v3030_v40 = vpack.c.bf16 %v505_v15, %v501_v33  ;;  %v3033_v41 = vsub.f32 %v3005_v28, %v501_v33  ;;  %v655_v47 = vsub.f32 %v2999_v21, %v654_v35  ;;  %v581_v15 = vand.u32 4294901760, %v580_v26 }
  0xdb   : > { %v642_v45 = vand.u32 4294901760, %v3024_v17  ;;  %v649_v59 = vsub.f32 %v3008_v29, %v648_v39  ;;  %v591_v33 = vsub.f32 %v3015_v32, %v590_v48  ;;  %v2269_v26 = vpack.c.bf16 %v2945_v50, %v2952_v52 }
  0xdc   : > { %2258 = vmatprep.subr.bf16.mxu0 %v3030_v40  ;;  %v636_v55 = vand.u32 4294901760, %v3033_v41  ;;  %v656_v24 = vand.u32 4294901760, %v655_v47  ;;  %v2275_v6 = vpack.c.bf16 %v2999_v21, %v3024_v17  ;;  %v2287_v52 = vpack.c.bf16 %v630_v8, %v618_v16 }
  0xdd   : > { %2260 = vmatpush1.bf16.msra.mxu0 %v3021_v37  ;;  %v643_v5 = vsub.f32 %v3024_v17, %v642_v45  ;;  %v650_v19 = vand.u32 4294901760, %v649_v59  ;;  %v592_v27 = vand.u32 4294901760, %v591_v33  ;;  %v2273_v59 = vpack.c.bf16 %v3008_v29, %v3033_v41  ;;  %v2221_v33 = vld [vmem:[%s3434_s4 + $0x30] sm:$0xff] }
  0xde   : > { %2262 = vmatprep.subr.bf16.mxu0 %v2261_v51  ;;  %v637_v11 = vsub.f32 %v3033_v41, %v636_v55  ;;  %v2271_v51 = vpack.c.bf16 %v2962_v57, %v2967_v60  ;;  %v2289_v50 = vpack.c.bf16 %v648_v39, %v636_v55  ;;  %v2220_v41 = vld [vmem:[%s3434_s4 + $0x28] sm:$0xff] }
  0xdf   : > { %v644_v2 = vand.u32 4294901760, %v643_v5  ;;  %v2285_v5 = vpack.c.bf16 %v624_v58, %v612_v0  ;;  %v2291_v58 = vpack.c.bf16 %v654_v35, %v642_v45 }
  0xe0   : > { %571 = vmatmul.mubr.f32.vlgmr.msra.gmra.mrb[0].mxu0 %v570_v22  ;;  %v638_v31 = vand.u32 4294901760, %v637_v11  ;;  %v602_v22 = vsub.f32 %v3049_v1, %v601_v34 }
  0xe1   : > { %2264 = vmatpush1.bf16.msra.mxu0 %v2263_v13  ;;  %576 = vmatprep.mubr.f32.mxu0 %v2632_v63  ;;  %v2267_v38 = vpack.c.bf16 %v656_v24, %v644_v2 }
  0xe2   : > { %v2265_v42 = vpack.c.bf16 %v650_v19, %v638_v31  ;;  %v603_v47 = vand.u32 4294901760, %v602_v22 }
  0xe4   : > { %582 = vmatmul.mubr.f32.gmra.mrb[2].mxu0 %v581_v15  ;;  %2266 = vmatprep.subr.bf16.mxu0 %v2265_v42  ;;  %v1241_v15 = vsel %vm480_vm0, %v2220_v41, 0 }
  0xe5   : > { %2268 = vmatpush1.bf16.msra.mxu0 %v2267_v38  ;;  %587 = vmatprep.mubr.f32.mxu0 %v2632_v63 }
  0xe6   : > { %2270 = vmatprep.subr.bf16.mxu0 %v2269_v26 }
  0xe8   : > { %593 = vmatmul.mubr.f32.gmra.mrb[4].mxu0 %v592_v27 }
  0xe9   : > { %598 = vmatprep.mubr.f32.mxu0 %v2632_v63 }
  0xec   : > { %604 = vmatmul.mubr.f32.gmra.mrb[6].mxu0 %v603_v47 }
  0xed   : > { %714 = vmatprep.mubr.f32.mxu0 %v2632_v63 }
  0xf0   : > { %716 = vmatmul.mubr.f32.vlgmr.msra.gmra.mrb[0].mxu0 %v2903_v12 }
  0xf1   : > { %2272 = vmatpush1.bf16.msra.mxu0 %v2271_v51  ;;  %721 = vmatprep.mubr.f32.mxu0 %v2632_v63  ;;  %v1244_v51 = vsel %vm480_vm0, %v2221_v33, 0 }
  0xf2   : > { %2274 = vmatprep.subr.bf16.mxu0 %v2273_v59 }
  0xf4   : > { %723 = vmatmul.mubr.f32.gmra.mrb[2].mxu0 %v2956_v54 }
  0xf5   : > { %2276 = vmatpush1.bf16.msra.mxu0 %v2275_v6  ;;  %728 = vmatprep.mubr.f32.mxu0 %v2632_v63 }
  0xf6   : > { %2278 = vmatprep.subr.bf16.mxu0 %v2938_v46 }
  0xf8   : > { %730 = vmatmul.mubr.f32.gmra.mrb[4].mxu0 %v2985_v9 }
  0xf9   : > { %735 = vmatprep.mubr.f32.mxu0 %v2632_v63 }
  0xfc   : > { %737 = vmatmul.mubr.f32.gmra.mrb[6].mxu0 %v3019_v18 }
  0xfd   : > { %823 = vmatprep.mubr.f32.mxu0 %v2632_v63 }
 0x100   : > { %826 = vmatmul.mubr.f32.vlgmr.msra.gmra.mrb[0].mxu0 %v2931_v43  ;;  %v463_v43 = vpop.permute.xlu1 %462 }
 0x101   : > { %2280 = vmatpush1.bf16.msra.mxu0 %v2933_v44  ;;  %831 = vmatprep.mubr.f32.mxu0 %v2632_v63 }
 0x102   : > { %2282 = vmatprep.subr.bf16.mxu0 %v3030_v40 }
 0x104   : > { %834 = vmatmul.mubr.f32.gmra.mrb[2].mxu0 %v2974_v4  ;;  %v468_v60 = vpop.permute.xlu1 %467 }
 0x105   : > { %2284 = vmatpush1.bf16.msra.mxu0 %v3021_v37  ;;  %839 = vmatprep.mubr.f32.mxu0 %v2632_v63 }
 0x106   : > { %2286 = vmatprep.subr.bf16.mxu0 %v2285_v5 }
 0x108   : > { %842 = vmatmul.mubr.f32.gmra.mrb[4].mxu0 %v3015_v32 }
 0x109   : > { %847 = vmatprep.mubr.f32.mxu0 %v2632_v63 }
 0x10c   : > { %850 = vmatmul.mubr.f32.gmra.mrb[6].mxu0 %v3049_v1 }
 0x10d   : > { %928 = vmatprep.mubr.f32.mxu0 %v2632_v63 }
 0x110   : > { %932 = vmatmul.mubr.f32.vlgmr.msra.gmra.mrb[0].mxu0 %v568_v53 }
 0x111   : > { %2288 = vmatpush1.bf16.msra.mxu0 %v2287_v52  ;;  %937 = vmatprep.mubr.f32.mxu0 %v2632_v63 }
 0x112   : > { %2290 = vmatprep.subr.bf16.mxu0 %v2289_v50 }
 0x114   : > { %941 = vmatmul.mubr.f32.gmra.mrb[2].mxu0 %v579_v23 }
 0x115   : > { %2292 = vmatpush1.bf16.msra.mxu0 %v2291_v58  ;;  %946 = vmatprep.mubr.f32.mxu0 %v2632_v63 }
 0x116   : > { %2294 = vmatprep.subr.bf16.mxu0 %v2938_v46 }
 0x118   : > { %950 = vmatmul.mubr.f32.gmra.mrb[4].mxu0 %v590_v48 }
 0x119   : > { %955 = vmatprep.mubr.f32.mxu0 %v2632_v63 }
 0x11c   : > { %959 = vmatmul.mubr.f32.gmra.mrb[6].mxu0 %v601_v34 }
 0x11d   : > { %1053 = vmatprep.mubr.f32.mxu0 %v2632_v63 }
 0x120   : > { %1055 = vmatmul.mubr.f32.vlgmr.msra.gmra.mrb[0].mxu0 %v2903_v12 }
 0x121   : > { %2296 = vmatpush1.bf16.msra.mxu0 %v2933_v44  ;;  %1060 = vmatprep.mubr.f32.mxu0 %v2632_v63 }
 0x122   : > { %2298 = vmatprep.subr.bf16.mxu0 %v3030_v40 }
 0x124   : > { %1062 = vmatmul.mubr.f32.gmra.mrb[2].mxu0 %v2956_v54 }
 0x125   : > { %2300 = vmatpush1.bf16.msra.mxu0 %v3021_v37  ;;  %1067 = vmatprep.mubr.f32.mxu0 %v2632_v63 }
 0x128   : > { %1069 = vmatmul.mubr.f32.gmra.mrb[4].mxu0 %v2985_v9 }
 0x129   : > { %1074 = vmatprep.mubr.f32.mxu0 %v2632_v63 }
 0x12c   : > { %1076 = vmatmul.mubr.f32.gmra.mrb[6].mxu0 %v3019_v18 }
 0x12d   : > { %1154 = vmatprep.mubr.f32.mxu0 %v2632_v63 }
 0x130   : > { %1156 = vmatmul.mubr.f32.vlgmr.msra.gmra.mrb[0].mxu0 %v2903_v12 }
 0x131   : > { %1161 = vmatprep.mubr.f32.mxu0 %v2632_v63 }
 0x134   : > { %1163 = vmatmul.mubr.f32.gmra.mrb[2].mxu0 %v2956_v54  ;;  %v2219_v54 = vld [vmem:[%s3434_s4 + $0x20] sm:$0xff] }
 0x135   : > { %1168 = vmatprep.mubr.f32.mxu0 %v2632_v63  ;;  %v1238_v21 = vsel %vm480_vm0, %v2219_v54, 0 }
 0x136   : > { %v3144_v35 = vand.u32 4294901760, %v1238_v21 }
 0x138   : > { %1170 = vmatmul.mubr.f32.gmra.mrb[4].mxu0 %v2985_v9  ;;  %v473_v9 = vpop.permute.xlu0 %472  ;;  %v3150_v11 = vsub.f32 %v1238_v21, %v3144_v35 }
 0x139   : > { %1175 = vmatprep.mubr.f32.mxu0 %v2632_v63 }
 0x13a   : > { %v1324_v42 = vand.u32 4294901760, %v3150_v11 }
 0x13c   : > { %1177 = vmatmul.mubr.f32.gmra.mrb[6].mxu0 %v3019_v18  ;;  %v478_v18 = vpop.permute.xlu1 %477 }
 0x203   : > { %v1157_v44 = vpop.f32.mrb[0].mxu0 }
 0x204   : > { %v2349_v46 = vadd.f32 %v1157_v44, %v463_v43  ;;  %v1159_v53 = vpop.f32.mrb[1].mxu0 }
 0x205   : > { %v2350_v57 = vadd.f32 %v1159_v53, %v463_v43 }
 0x206   : > { %2518 = vtanh.f32 %v2349_v46  ;;  %v3196_v46 = vand.u32 4294901760, %v1244_v51 }
 0x207   : > { %2520 = vtanh.f32 %v2350_v57  ;;  %v1164_v12 = vpop.f32.mrb[2].mxu0 }
 0x208   : > { %v2351_v0 = vadd.f32 %v1164_v12, %v468_v60  ;;  %v1166_v4 = vpop.f32.mrb[3].mxu0 }
 0x209   : > { %v2352_v8 = vadd.f32 %v1166_v4, %v468_v60 }
 0x20a   : > { %2522 = vtanh.f32 %v2351_v0  ;;  %v2222_v0 = vld [vmem:[%s3434_s4 + $0x38] sm:$0xff] }
 0x20b   : > { %2524 = vtanh.f32 %v2352_v8  ;;  %v1171_v16 = vpop.f32.mrb[4].mxu0 }
 0x20c   : > { %v2353_v23 = vadd.f32 %v1171_v16, %v473_v9  ;;  %v1173_v29 = vpop.f32.mrb[5].mxu0 }
 0x20d   : > { %v2354_v32 = vadd.f32 %v1173_v29, %v473_v9 }
 0x20e   : > { %2526 = vtanh.f32 %v2353_v23 }
 0x20f   : > { %2528 = vtanh.f32 %v2354_v32  ;;  %v1178_v37 = vpop.f32.mrb[6].mxu0 }
 0x210   : > { %v2519_v17 = vpop.eup %2518  ;;  %v2355_v39 = vadd.f32 %v1178_v37, %v478_v18  ;;  %v1180_v40 = vpop.f32.mrb[7].mxu0 }
 0x211   : > { %v2521_v45 = vpop.eup %2520  ;;  %v1191_v48 = vmul.f32 0.5, %v2519_v17  ;;  %v2356_v55 = vadd.f32 %v1180_v40, %v478_v18  ;;  %v1247_v17 = vsel %vm480_vm0, %v2222_v0, 0 }
 0x212   : > { %v1192_v1 = vmul.f32 0.5, %v2521_v45  ;;  %2530 = vtanh.f32 %v2355_v39 }
 0x213   : > { %v3153_v13 = vadd.f32 %v2905_v14, %v1191_v48  ;;  %2532 = vtanh.f32 %v2356_v55  ;;  %v3164_v14 = vand.u32 4294901760, %v1241_v15 }
 0x214   : > { %v2523_v2 = vpop.eup %2522  ;;  %v3157_v24 = vadd.f32 %v2909_v30, %v1192_v1 }
 0x215   : > { %v2525_v31 = vpop.eup %2524  ;;  %v1193_v19 = vmul.f32 0.5, %v2523_v2  ;;  %v1251_v27 = vand.u32 4294901760, %v3153_v13  ;;  %v3248_v2 = vand.u32 4294901760, %v1247_v17 }
 0x216   : > { %v1194_v34 = vmul.f32 0.5, %v2525_v31  ;;  %v1249_v38 = vand.u32 4294901760, %v3157_v24 }
 0x217   : > { %v3167_v26 = vadd.f32 %v2914_v25, %v1193_v19  ;;  %v3182_v25 = vsub.f32 %v3150_v11, %v1324_v42  ;;  %v3191_v43 = vsub.f32 %v3153_v13, %v1251_v27  ;;  %v3276_v0 = vsub.f32 %v1247_v17, %v3248_v2 }
 0x218   : > { %v2527_v30 = vpop.eup %2526  ;;  %v3171_v22 = vadd.f32 %v2919_v36, %v1194_v34  ;;  %v3174_v47 = vsub.f32 %v3157_v24, %v1249_v38  ;;  %v3185_v36 = vsub.f32 %v1241_v15, %v3164_v14 }
 0x219   : > { %v2529_v59 = vpop.eup %2528  ;;  %v1195_v6 = vmul.f32 0.5, %v2527_v30  ;;  %v1255_v5 = vand.u32 4294901760, %v3167_v26  ;;  %v1374_v37 = vand.u32 4294901760, %v3191_v43  ;;  %v1326_v19 = vand.u32 4294901760, %v3182_v25 }
 0x21a   : > { %v1196_v52 = vmul.f32 0.5, %v2529_v59  ;;  %v1253_v50 = vand.u32 4294901760, %v3171_v22  ;;  %v1335_v29 = vand.u32 4294901760, %v3185_v36 }
 0x21b   : > { %v3188_v58 = vadd.f32 %v2996_v20, %v1195_v6  ;;  %v3194_v44 = vsub.f32 %v3167_v26, %v1255_v5  ;;  %v1368_v20 = vand.u32 4294901760, %v3174_v47  ;;  %v3210_v8 = vpack.c.bf16 %v1255_v5, %v1251_v27 }
 0x21c   : > { %v2531_v53 = vpop.eup %2530  ;;  %v3199_v57 = vadd.f32 %v3005_v28, %v1196_v52  ;;  %v3201_v60 = vpack.c.bf16 %v1253_v50, %v1249_v38  ;;  %v3204_v12 = vsub.f32 %v3171_v22, %v1253_v50  ;;  %v1375_v33 = vsub.f32 %v3191_v43, %v1374_v37 }
 0x21d   : > { %v2533_v4 = vpop.eup %2532  ;;  %v1197_v54 = vmul.f32 0.5, %v2531_v53  ;;  %v1259_v9 = vand.u32 4294901760, %v3188_v58  ;;  %v1386_v28 = vand.u32 4294901760, %v3194_v44 }
 0x21e   : > { %v1198_v16 = vmul.f32 0.5, %v2533_v4  ;;  %2302 = vmatprep.subr.bf16.mxu1 %v3201_v60  ;;  %v1257_v21 = vand.u32 4294901760, %v3199_v57  ;;  %v1380_v23 = vand.u32 4294901760, %v3204_v12  ;;  %v1376_v4 = vand.u32 4294901760, %v1375_v33 }
 0x21f   : > { %v3219_v32 = vadd.f32 %v2982_v7, %v1197_v54  ;;  %2304 = vmatpush1.bf16.msra.mxu1 %v3210_v8  ;;  %v3223_v18 = vsub.f32 %v3188_v58, %v1259_v9  ;;  %v1369_v7 = vsub.f32 %v3174_v47, %v1368_v20  ;;  %v1387_v48 = vsub.f32 %v3194_v44, %v1386_v28 }
 0x220   : > { %v3228_v39 = vadd.f32 %v2987_v10, %v1198_v16  ;;  %v3231_v40 = vsub.f32 %v3199_v57, %v1257_v21  ;;  %v1381_v41 = vsub.f32 %v3204_v12, %v1380_v23  ;;  %v3244_v10 = vsub.f32 %v1244_v51, %v3196_v46 }
 0x221   : > { %v1263_v45 = vand.u32 4294901760, %v3219_v32  ;;  %v1398_v34 = vand.u32 4294901760, %v3223_v18  ;;  %v1370_v30 = vand.u32 4294901760, %v1369_v7  ;;  %v1336_v51 = vsub.f32 %v3185_v36, %v1335_v29 }
 0x222   : > { %v1261_v55 = vand.u32 4294901760, %v3228_v39  ;;  %v1382_v1 = vand.u32 4294901760, %v1381_v41  ;;  %v1392_v15 = vand.u32 4294901760, %v3231_v40  ;;  %v1388_v6 = vand.u32 4294901760, %v1387_v48 }
 0x223   : > { %v3251_v31 = vsub.f32 %v3219_v32, %v1263_v45  ;;  %v3266_v59 = vpack.c.bf16 %v1263_v45, %v1259_v9  ;;  %v1346_v52 = vand.u32 4294901760, %v3244_v10  ;;  %v1399_v54 = vsub.f32 %v3223_v18, %v1398_v34 }
 0x224   : > { %v3258_v38 = vpack.c.bf16 %v1261_v55, %v1257_v21  ;;  %v3261_v27 = vsub.f32 %v3228_v39, %v1261_v55  ;;  %v2309_v50 = vpack.c.bf16 %v1382_v1, %v1370_v30  ;;  %v1393_v25 = vsub.f32 %v3231_v40, %v1392_v15 }
 0x225   : > { %v1410_v5 = vand.u32 4294901760, %v3251_v31  ;;  %v2311_v21 = vpack.c.bf16 %v1388_v6, %v1376_v4  ;;  %v1337_v7 = vand.u32 4294901760, %v1336_v51  ;;  %v1347_v48 = vsub.f32 %v3244_v10, %v1346_v52 }
 0x226   : > { %2306 = vmatprep.subr.bf16.mxu1 %v3258_v38  ;;  %v1404_v53 = vand.u32 4294901760, %v3261_v27  ;;  %v1394_v41 = vand.u32 4294901760, %v1393_v25  ;;  %v1357_v55 = vand.u32 4294901760, %v3276_v0  ;;  %v1400_v1 = vand.u32 4294901760, %v1399_v54 }
 0x227   : > { %2308 = vmatpush1.bf16.msra.mxu1 %v3266_v59  ;;  %v1411_v9 = vsub.f32 %v3251_v31, %v1410_v5  ;;  %v2317_v51 = vpack.c.bf16 %v3204_v12, %v3174_v47  ;;  %v2319_v25 = vpack.c.bf16 %v3194_v44, %v3191_v43  ;;  %v2321_v4 = vpack.c.bf16 %v3261_v27, %v3231_v40 }
 0x228   : > { %2310 = vmatprep.subr.bf16.mxu1 %v2309_v50  ;;  %v1405_v16 = vsub.f32 %v3261_v27, %v1404_v53  ;;  %v1358_v6 = vsub.f32 %v3276_v0, %v1357_v55  ;;  %v2323_v54 = vpack.c.bf16 %v3251_v31, %v3223_v18  ;;  %v2335_v47 = vpack.c.bf16 %v1386_v28, %v1374_v37 }
 0x229   : > { %v1412_v17 = vand.u32 4294901760, %v1411_v9  ;;  %v2333_v9 = vpack.c.bf16 %v1380_v23, %v1368_v20  ;;  %v2337_v12 = vpack.c.bf16 %v1404_v53, %v1392_v15  ;;  %v2339_v43 = vpack.c.bf16 %v1410_v5, %v1398_v34  ;;  %v1225_v20 = vpop.permute.xlu0 %1224 }
 0x22a   : > { %1327 = vmatmul.mubr.f32.vlgmr.msra.gmra.mrb[0].mxu1 %v1326_v19  ;;  %v1406_v45 = vand.u32 4294901760, %v1405_v16  ;;  %v1348_v19 = vand.u32 4294901760, %v1347_v48  ;;  %v1359_v50 = vand.u32 4294901760, %v1358_v6 }
 0x22b   : > { %2312 = vmatpush1.bf16.msra.mxu1 %v2311_v21  ;;  %1332 = vmatprep.mubr.f32.mxu1 %v2632_v63  ;;  %v2315_v30 = vpack.c.bf16 %v1412_v17, %v1400_v1 }
 0x22c   : > { %v2313_v33 = vpack.c.bf16 %v1406_v45, %v1394_v41 }
 0x22d   : > { %v1235_v37 = vpop.permute.xlu0 %1234 }
 0x22e   : > { %1338 = vmatmul.mubr.f32.gmra.mrb[2].mxu1 %v1337_v7  ;;  %2314 = vmatprep.subr.bf16.mxu1 %v2313_v33 }
 0x22f   : > { %2316 = vmatpush1.bf16.msra.mxu1 %v2315_v30  ;;  %1343 = vmatprep.mubr.f32.mxu1 %v2632_v63 }
 0x230   : > { %2318 = vmatprep.subr.bf16.mxu1 %v2317_v51 }
 0x231   : > { %v1975_v41 = vpop.permute.xlu0 %1974 }
 0x232   : > { %1349 = vmatmul.mubr.f32.gmra.mrb[4].mxu1 %v1348_v19 }
 0x233   : > { %1354 = vmatprep.mubr.f32.mxu1 %v2632_v63 }
 0x236   : > { %1360 = vmatmul.mubr.f32.gmra.mrb[6].mxu1 %v1359_v50 }
 0x237   : > { %1470 = vmatprep.mubr.f32.mxu1 %v2632_v63 }
 0x23a   : > { %1472 = vmatmul.mubr.f32.vlgmr.msra.gmra.mrb[0].mxu1 %v3144_v35 }
 0x23b   : > { %2320 = vmatpush1.bf16.msra.mxu1 %v2319_v25  ;;  %1477 = vmatprep.mubr.f32.mxu1 %v2632_v63 }
 0x23c   : > { %2322 = vmatprep.subr.bf16.mxu1 %v2321_v4 }
 0x23e   : > { %1479 = vmatmul.mubr.f32.gmra.mrb[2].mxu1 %v3164_v14 }
 0x23f   : > { %2324 = vmatpush1.bf16.msra.mxu1 %v2323_v54  ;;  %1484 = vmatprep.mubr.f32.mxu1 %v2632_v63 }
 0x240   : > { %2326 = vmatprep.subr.bf16.mxu1 %v3201_v60 }
 0x242   : > { %1486 = vmatmul.mubr.f32.gmra.mrb[4].mxu1 %v3196_v46 }
 0x243   : > { %1491 = vmatprep.mubr.f32.mxu1 %v2632_v63 }
 0x246   : > { %1493 = vmatmul.mubr.f32.gmra.mrb[6].mxu1 %v3248_v2 }
 0x247   : > { %1579 = vmatprep.mubr.f32.mxu1 %v2632_v63 }
 0x24a   : > { %1582 = vmatmul.mubr.f32.vlgmr.msra.gmra.mrb[0].mxu1 %v3150_v11  ;;  %v1220_v11 = vpop.permute.xlu1 %1219 }
 0x24b   : > { %2328 = vmatpush1.bf16.msra.mxu1 %v3210_v8  ;;  %1587 = vmatprep.mubr.f32.mxu1 %v2632_v63 }
 0x24c   : > { %2330 = vmatprep.subr.bf16.mxu1 %v3258_v38 }
 0x24e   : > { %1590 = vmatmul.mubr.f32.gmra.mrb[2].mxu1 %v3185_v36  ;;  %v1230_v23 = vpop.permute.xlu1 %1229 }
 0x24f   : > { %2332 = vmatpush1.bf16.msra.mxu1 %v3266_v59  ;;  %1595 = vmatprep.mubr.f32.mxu1 %v2632_v63 }
 0x250   : > { %2334 = vmatprep.subr.bf16.mxu1 %v2333_v9 }
 0x252   : > { %1598 = vmatmul.mubr.f32.gmra.mrb[4].mxu1 %v3244_v10 }
 0x253   : > { %1603 = vmatprep.mubr.f32.mxu1 %v2632_v63 }
 0x256   : > { %1606 = vmatmul.mubr.f32.gmra.mrb[6].mxu1 %v3276_v0  ;;  %v1970_v0 = vpop.permute.xlu1 %1969 }
 0x257   : > { %1684 = vmatprep.mubr.f32.mxu1 %v2632_v63 }
 0x25a   : > { %1688 = vmatmul.mubr.f32.vlgmr.msra.gmra.mrb[0].mxu1 %v1324_v42  ;;  %v1980_v25 = vpop.permute.xlu1 %1979 }
 0x25b   : > { %2336 = vmatpush1.bf16.msra.mxu1 %v2335_v47  ;;  %1693 = vmatprep.mubr.f32.mxu1 %v2632_v63 }
 0x25c   : > { %2338 = vmatprep.subr.bf16.mxu1 %v2337_v12 }
 0x25e   : > { %1697 = vmatmul.mubr.f32.gmra.mrb[2].mxu1 %v1335_v29 }
 0x25f   : > { %2340 = vmatpush1.bf16.msra.mxu1 %v2339_v43  ;;  %1702 = vmatprep.mubr.f32.mxu1 %v2632_v63 }
 0x260   : > { %2342 = vmatprep.subr.bf16.mxu1 %v3201_v60 }
 0x262   : > { %1706 = vmatmul.mubr.f32.gmra.mrb[4].mxu1 %v1346_v52 }
 0x263   : > { %1711 = vmatprep.mubr.f32.mxu1 %v2632_v63 }
 0x266   : > { %1715 = vmatmul.mubr.f32.gmra.mrb[6].mxu1 %v1357_v55 }
 0x267   : > { %1809 = vmatprep.mubr.f32.mxu1 %v2632_v63 }
 0x26a   : > { %1811 = vmatmul.mubr.f32.vlgmr.msra.gmra.mrb[0].mxu1 %v3144_v35 }
 0x26b   : > { %2344 = vmatpush1.bf16.msra.mxu1 %v3210_v8  ;;  %1816 = vmatprep.mubr.f32.mxu1 %v2632_v63 }
 0x26c   : > { %2346 = vmatprep.subr.bf16.mxu1 %v3258_v38 }
 0x26e   : > { %1818 = vmatmul.mubr.f32.gmra.mrb[2].mxu1 %v3164_v14 }
 0x26f   : > { %2348 = vmatpush1.bf16.msra.mxu1 %v3266_v59  ;;  %1823 = vmatprep.mubr.f32.mxu1 %v2632_v63 }
 0x272   : > { %1825 = vmatmul.mubr.f32.gmra.mrb[4].mxu1 %v3196_v46 }
 0x273   : > { %1830 = vmatprep.mubr.f32.mxu1 %v2632_v63 }
 0x276   : > { %1832 = vmatmul.mubr.f32.gmra.mrb[6].mxu1 %v3248_v2 }
 0x277   : > { %1910 = vmatprep.mubr.f32.mxu1 %v2632_v63 }
 0x27a   : > { %1912 = vmatmul.mubr.f32.vlgmr.msra.gmra.mrb[0].mxu1 %v3144_v35 }
 0x27b   : > { %1917 = vmatprep.mubr.f32.mxu1 %v2632_v63 }
 0x27e   : > { %1919 = vmatmul.mubr.f32.gmra.mrb[2].mxu1 %v3164_v14 }
 0x27f   : > { %1924 = vmatprep.mubr.f32.mxu1 %v2632_v63 }
 0x282   : > { %1926 = vmatmul.mubr.f32.gmra.mrb[4].mxu1 %v3196_v46 }
 0x283   : > { %1931 = vmatprep.mubr.f32.mxu1 %v2632_v63 }
 0x286   : > { %1933 = vmatmul.mubr.f32.gmra.mrb[6].mxu1 %v3248_v2 }
 0x34d   : > { %v1913_v42 = vpop.f32.mrb[0].mxu1 }
 0x34e   : > { %v2357_v36 = vadd.f32 %v1913_v42, %v1220_v11  ;;  %v1915_v44 = vpop.f32.mrb[1].mxu1 }
 0x34f   : > { %v2358_v60 = vadd.f32 %v1915_v44, %v1220_v11  ;;  %v1985_v11 = vpop.permute.xlu0 %1984 }
 0x350   : > { %2534 = vtanh.f32 %v2357_v36 }
 0x351   : > { %2536 = vtanh.f32 %v2358_v60  ;;  %v1920_v35 = vpop.f32.mrb[2].mxu1 }
 0x352   : > { %v2359_v8 = vadd.f32 %v1920_v35, %v1225_v20  ;;  %v1922_v28 = vpop.f32.mrb[3].mxu1 }
 0x353   : > { %v2360_v14 = vadd.f32 %v1922_v28, %v1225_v20 }
 0x354   : > { %2538 = vtanh.f32 %v2359_v8 }
 0x355   : > { %2540 = vtanh.f32 %v2360_v14  ;;  %v1927_v46 = vpop.f32.mrb[4].mxu1 }
 0x356   : > { %v2361_v29 = vadd.f32 %v1927_v46, %v1230_v23  ;;  %v1929_v63 = vpop.f32.mrb[5].mxu1  ;;  %v2633_v46 = vmov 1966171168  }
 0x357   : > { %v2362_v18 = vadd.f32 %v1929_v63, %v1230_v23 }
 0x358   : > { %2542 = vtanh.f32 %v2361_v29  ;;  %v2119_v29 = vunpack.c.l.s4 %v2633_v46 }
 0x359   : > { %2544 = vtanh.f32 %v2362_v18  ;;  %v1934_v40 = vpop.f32.mrb[6].mxu1 }
 0x35a   : > { %v2535_v10 = vpop.eup %2534  ;;  %v2363_v15 = vadd.f32 %v1934_v40, %v1235_v37  ;;  %v1936_v2 = vpop.f32.mrb[7].mxu1  ;;  %v2120_v40 = vunpack.c.0.s8 %v2119_v29 }
 0x35b   : > { %v2537_v31 = vpop.eup %2536  ;;  %v1947_v34 = vmul.f32 0.5, %v2535_v10  ;;  %v2364_v38 = vadd.f32 %v1936_v2, %v1235_v37 }
 0x35c   : > { %v1948_v27 = vmul.f32 0.5, %v2537_v31  ;;  %2546 = vtanh.f32 %v2363_v15 }
 0x35d   : > { %2548 = vtanh.f32 %v2364_v38  ;;  %v1955_v52 = vadd.f32 %v1947_v34, %v3153_v13  ;;  %v2123_v34 = vsub.s32 %v2120_v40, %v2836_v56 }
 0x35e   : > { %v2539_v59 = vpop.eup %2538  ;;  %v1956_v16 = vadd.f32 %v1948_v27, %v3157_v24 }
 0x35f   : > { %v2541_v5 = vpop.eup %2540  ;;  %v1949_v53 = vmul.f32 0.5, %v2539_v59  ;;  %v1987_v55 = vmul.f32 %v1970_v0, %v1955_v52 }
 0x360   : > { %v1950_v21 = vmul.f32 0.5, %v2541_v5  ;;  %v1988_v30 = vmul.f32 %v1970_v0, %v1956_v16 }
 0x361   : > { %v1957_v7 = vadd.f32 %v1949_v53, %v3167_v26 }
 0x362   : > { %v2543_v17 = vpop.eup %2542  ;;  %v1958_v45 = vadd.f32 %v1950_v21, %v3171_v22 }
 0x363   : > { %v2545_v48 = vpop.eup %2544  ;;  %v1989_v1 = vmul.f32 %v1975_v41, %v1957_v7  ;;  %v1951_v33 = vmul.f32 0.5, %v2543_v17 }
 0x364   : > { %v1990_v51 = vmul.f32 %v1975_v41, %v1958_v45  ;;  %v1952_v19 = vmul.f32 0.5, %v2545_v48 }
 0x365   : > { %v1995_v6 = vadd.f32 %v1989_v1, %v1987_v55  ;;  %v1959_v13 = vadd.f32 %v1951_v33, %v3188_v58 }
 0x366   : > { %v2547_v50 = vpop.eup %2546  ;;  %v2004_v24 = vadd.f32 %v1990_v51, %v1988_v30  ;;  %v1960_v4 = vadd.f32 %v1952_v19, %v3199_v57 }
 0x367   : > { %v2549_v26 = vpop.eup %2548  ;;  %v1991_v54 = vmul.f32 %v1980_v25, %v1959_v13  ;;  %v1953_v9 = vmul.f32 0.5, %v2547_v50 }
 0x368   : > { %v1992_v47 = vmul.f32 %v1980_v25, %v1960_v4  ;;  %v1954_v22 = vmul.f32 0.5, %v2549_v26 }
 0x369   : > { %v1996_v12 = vadd.f32 %v1995_v6, %v1991_v54  ;;  %v1961_v43 = vadd.f32 %v1953_v9, %v3219_v32 }
 0x36a   : > { %v2005_v42 = vadd.f32 %v2004_v24, %v1992_v47  ;;  %v1962_v36 = vadd.f32 %v1954_v22, %v3228_v39  ;;  %v2106_v39 = vrot.slane %v2841_v61, %v2854_v3 }
 0x36b   : > { %v1993_v44 = vmul.f32 %v1985_v11, %v1961_v43 }
 0x36c   : > { %v1994_v58 = vmul.f32 %v1985_v11, %v1962_v36 }
 0x36d   : > { %v1997_v60 = vadd.f32 %v1996_v12, %v1993_v44 }
 0x36e   : > { %v2006_v20 = vadd.f32 %v2005_v42, %v1994_v58 }
 0x36f   : > { %v1998_v35 = vrot.slane %v1997_v60, 4 }
 0x370   : > { %v2007_v8 = vrot.slane %v2006_v20, 4 }
 0x371   : > { %v1999_v57 = vadd.f32 %v1998_v35, %v1997_v60 }
 0x372   : > { %v2008_v28 = vadd.f32 %v2007_v8, %v2006_v20 }
 0x373   : > { %v2000_v14 = vrot.slane %v1999_v57, 2 }
 0x374   : > { %v2009_v23 = vrot.slane %v2008_v28, 2 }
 0x375   : > { %v2001_v63 = vadd.f32 %v2000_v14, %v1999_v57 }
 0x376   : > { %v2010_v32 = vadd.f32 %v2009_v23, %v2008_v28 }
 0x377   : > { %v2002_v18 = vrot.slane %v2001_v63, 1 }
 0x378   : > { %v2011_v37 = vrot.slane %v2010_v32, 1 }
 0x379   : > { %v2003_v10 = vadd.f32 %v2002_v18, %v2001_v63 }
 0x37a   : > { %v2012_v15 = vadd.f32 %v2011_v37, %v2010_v32 }
 0x37b   : > { %v2113_v2 = vadd.f32 %v2106_v39, %v2003_v10 }
 0x37c   : > { %v2114_v31 = vadd.f32 %v2846_v62, %v2012_v15 }
 0x37e   : > { %v2117_v38 = vcombine.low %v2113_v2, %v2114_v31 }
 0x380   : > { %v2124_v27 = vrot.slane %v2117_v38, %v2123_v34 }
 0x382   : > { %v2131_v59 = vrot.slane %v2124_v27, %v2123_v34 }
 0x384   : > { %2137 = vst.msk [vmem:[%s252_s14] sm:$0x3] %vm2135_vm1, %v2131_v59 }
 0x385   : > { %2575 = shalt.err (!%p2572_p8)
}
 0x386   : > { %s2576_s18 = scalar_lea.hbm %s3388_s28, 32  ;;  %s2580_s26 = scalar_lea.hbm %s3437_s7, 128 }
 0x387   : > { %p2577_p9 = scmp.ne.s32.totalorder %s3388_s28, %s2576_s18  ;;  %p2581_p0 = scmp.lt.u32.totalorder %s3388_s28, %s3437_s7 }
 0x388   : > { %p2582_p1 = scmp.lt.u32.totalorder %s2580_s26, %s2576_s18  ;;  %p2584_p3 = scmp.lt.u32.totalorder %s2576_s18, %s3388_s28 }
 0x389   : > { %p2578_p12 = pnand %p2577_p9, %p2716_p10 }
 0x38a   : > { %p2583_p2 = por %p2582_p1, %p2581_p0 }
 0x38b   : > { %p2579_p13 = pneg %p2578_p12 }
 0x38c   : > { %p2585_p4 = por %p2584_p3, %p2583_p2 }
 0x38e   : > { %p2586_p5 = pnand %p2585_p4, %p2579_p13 }
 0x390   : > { %2589 = shalt.err (!%p2586_p5)
}
 0x391   : > { %2445 = dma.vmem_to_hbm [thread:$0]  (%p2716_p10), %s3390_s16, 32, %s3388_s28, %s2139_s10  }
 0x392 PF: > { %s3453_s24 = sld [smem:[#allocation10_spill]]  ;;  %s3454_s23 = sld [smem:[#allocation8_spill]] }
 0x398   : > { %p2451_p6 = scmp.ge.s32.totalorder %s3453_s24, 2  ;;  %s2165_s29 = sand.u32 1, %s3454_s23  }
 0x399   : > { %s2166_s8 = scalar_lea.sflag [#allocation5], %s2165_s29 }
 0x39a   : > { %p2448_p7 = pnand %p2451_p6, %p2720_p11 }
 0x39c   : > { %2609 = dma.done.wait (!%p2448_p7), %s2166_s8, 32  }
 0x39d   : > { %2611 = vsyncadd (!%p2448_p7), %s2166_s8, 4294967264  ;;  %s3456_s8 = sld [smem:[#allocation11_spill]]  ;;  %s3457_s11 = sld [smem:[#allocation9_spill]] }
 0x39e   : > { %s3458_s0 = sld [smem:[#allocation12_spill]]  ;;  %s3459_s29 = smov %s2618_s30 }
 0x3a3   : > { %p23_p8 = scmp.ge.s32.totalorder %s3456_s8, 6   ;;  %s3460_s30 = smov %s3457_s11 }
 0x3a5   :  { %25 = sbr.rel (!%p23_p8) target bundleno = 18 (0x12), region = 81 }
 0x3ac   :  { %2171 = vsyncpa [#allocation5], 1 }
 0x3ad   :  { %2173 = vsyncpa [#allocation5 + $0x1], 1 }

</bundles_post_ra>
